<compile_context>
chip_gen: v7x
topology: tpu7x:2x2x1
jax: 0.10.0
libtpu: 0.0.40
codegen_flags: <defaults>
</compile_context>

<pallas_src>
import jax
import jax.numpy as jnp
from jax.experimental import pallas as pl
from jax.experimental.pallas import tpu as pltpu

NUM_CLASSES = 10
NUM_CHANNELS = 3
HIDDEN = 200
IN_FEATURES = NUM_CHANNELS * 32 * 32  # 3072

HIDDEN_PAD = 256            # 200 -> 256 (lane aligned)
OUT_PAD = 128               # 10  -> 128 (lane-dense output)
TILE_B_MAX = 1024           # f32 x tile: 1024*3072*4 B = 12 MiB per buffer
VMEM_LIMIT_BYTES = 48 * 1024 * 1024   # <= 64 MiB v7x physical; raises 16/32 MiB defaults


def _round_up(x, m):
    return (x + m - 1) // m * m


def mlp_kernel(x_ref, w1_ref, b1_ref, w2_ref, b2_ref, w3_ref, b3_ref, o_ref):
    # x arrives f32 straight from HBM; cast to bf16 in-kernel for the MXU.
    x = x_ref[...].astype(jnp.bfloat16)
    # layer 1 (bf16 MXU, f32 accumulate) + f32 bias + ReLU
    h1 = jnp.dot(x, w1_ref[...], preferred_element_type=jnp.float32)
    h1 = jnp.maximum(h1 + b1_ref[...], 0.0)
    # layer 2
    h2 = jnp.dot(h1.astype(jnp.bfloat16), w2_ref[...],
                 preferred_element_type=jnp.float32)
    h2 = jnp.maximum(h2 + b2_ref[...], 0.0)
    # classification head (no activation), bf16 lane-dense writeback
    out = jnp.dot(h2.astype(jnp.bfloat16), w3_ref[...],
                  preferred_element_type=jnp.float32)
    o_ref[...] = (out + b3_ref[...]).astype(o_ref.dtype)


def _pad_params(params):
    """Zero-pad to lane-aligned shapes; weights -> bf16, biases -> f32."""
    w1, b1, w2, b2, w3, b3 = params
    w1p = jnp.zeros((IN_FEATURES, HIDDEN_PAD), jnp.bfloat16).at[:, :HIDDEN].set(
        w1.astype(jnp.bfloat16))
    b1p = jnp.zeros((1, HIDDEN_PAD), jnp.float32).at[:, :HIDDEN].set(b1)
    w2p = jnp.zeros((HIDDEN_PAD, HIDDEN_PAD), jnp.bfloat16).at[:HIDDEN, :HIDDEN].set(
        w2.astype(jnp.bfloat16))
    b2p = jnp.zeros((1, HIDDEN_PAD), jnp.float32).at[:, :HIDDEN].set(b2)
    w3p = jnp.zeros((HIDDEN_PAD, OUT_PAD), jnp.bfloat16).at[:HIDDEN, :NUM_CLASSES].set(
        w3.astype(jnp.bfloat16))
    b3p = jnp.zeros((1, OUT_PAD), jnp.float32).at[:, :NUM_CLASSES].set(b3)
    return w1p, b1p, w2p, b2p, w3p, b3p


def _pick_tile_b(B):
    if B <= 8:
        # Single full-extent block (block dim == array dim is always legal).
        return B
    # >= 2 grid steps so v7x can shard the batch across both TensorCores;
    # sublane-aligned (multiple of 8) and capped for the VMEM budget.
    half = _round_up(pl.cdiv(B, 2), 8)
    return min(TILE_B_MAX, half)


def mlp_forward(x_nchw, params):
    w1p, b1p, w2p, b2p, w3p, b3p = _pad_params(params)

    B = x_nchw.shape[0]
    # PyTorch x.reshape(B, -1) on NCHW == row-major flatten; free, no dtype cast.
    x2d = x_nchw.reshape(B, IN_FEATURES)

    tile_b = _pick_tile_b(B)
    grid = (pl.cdiv(B, tile_b),)

    x_spec = pl.BlockSpec((tile_b, IN_FEATURES), lambda i: (i, 0))
    out_spec = pl.BlockSpec((tile_b, OUT_PAD), lambda i: (i, 0))

    def const_spec(arr):
        # Whole array, same block every step -> DMA'd once, VMEM-resident.
        return pl.BlockSpec(arr.shape, lambda i: (0, 0))

    flops = 2 * B * (IN_FEATURES * HIDDEN_PAD
                     + HIDDEN_PAD * HIDDEN_PAD
                     + HIDDEN_PAD * OUT_PAD)
    bytes_accessed = (
        x2d.size * x2d.dtype.itemsize
        + sum(a.size * a.dtype.itemsize for a in (w1p, b1p, w2p, b2p, w3p, b3p))
        + B * OUT_PAD * 2
    )

    out_padded = pl.pallas_call(
        mlp_kernel,
        out_shape=jax.ShapeDtypeStruct((B, OUT_PAD), jnp.bfloat16),
        grid_spec=pltpu.PrefetchScalarGridSpec(
            num_scalar_prefetch=0,
            grid=grid,
            in_specs=[
                x_spec,
                const_spec(w1p), const_spec(b1p),
                const_spec(w2p), const_spec(b2p),
                const_spec(w3p), const_spec(b3p),
            ],
            out_specs=out_spec,
        ),
        compiler_params=pltpu.CompilerParams(
            dimension_semantics=("parallel",),
            vmem_limit_bytes=VMEM_LIMIT_BYTES),
        cost_estimate=pl.CostEstimate(
            flops=flops, transcendentals=0, bytes_accessed=bytes_accessed),
    )(x2d, w1p, b1p, w2p, b2p, w3p, b3p)

    # Strip the class padding; cast the tiny (B, 10) logits slice back to f32.
    return out_padded[:, :NUM_CLASSES].astype(jnp.float32)


def init_params(key):
    """Deterministic init mimicking nn.Linear default (U[-1/sqrt(fan_in), +])."""
    def linear_init(k, fan_in, fan_out):
        kw, kb = jax.random.split(k)
        bound = 1.0 / jnp.sqrt(fan_in)
        # stored transposed relative to PyTorch: (in, out)
        w = jax.random.uniform(kw, (fan_in, fan_out), jnp.float32, -bound, bound)
        b = jax.random.uniform(kb, (1, fan_out), jnp.float32, -bound, bound)
        return w, b

    k1, k2, k3 = jax.random.split(key, 3)
    w1, b1 = linear_init(k1, IN_FEATURES, HIDDEN)
    w2, b2 = linear_init(k2, HIDDEN, HIDDEN)
    w3, b3 = linear_init(k3, HIDDEN, NUM_CLASSES)
    return (w1, b1, w2, b2, w3, b3)


if __name__ == "__main__":
    key = jax.random.PRNGKey(0)
    kx, kp = jax.random.split(key)

    # Small batch; channel/spatial dims fixed by the module (3*32*32 input).
    B = 2
    x = jax.random.normal(kx, (B, NUM_CHANNELS, 32, 32), dtype=jnp.float32)
    params = init_params(kp)

    out = mlp_forward(x, params)
    out = jax.block_until_ready(out)

    # Reference with matching bf16-weight / f32-accumulate / bf16-writeback numerics.
    w1, b1, w2, b2, w3, b3 = params
    xf = x.reshape(B, -1).astype(jnp.bfloat16)
    ref = jnp.maximum(
        jnp.dot(xf, w1.astype(jnp.bfloat16),
                preferred_element_type=jnp.float32) + b1, 0.0)
    ref = jnp.maximum(
        jnp.dot(ref.astype(jnp.bfloat16), w2.astype(jnp.bfloat16),
                preferred_element_type=jnp.float32) + b2, 0.0)
    ref = jnp.dot(ref.astype(jnp.bfloat16), w3.astype(jnp.bfloat16),
                  preferred_element_type=jnp.float32) + b3
    ref = ref.astype(jnp.bfloat16).astype(jnp.float32)   # match bf16 store

    assert out.shape == (B, NUM_CLASSES)
    assert jnp.allclose(out, ref, atol=2e-2, rtol=2e-2)

    print("KERNEL_OK")
</pallas_src>

<mosaic_0001>
module attributes {stable_mosaic.version = 11 : i64} {
  func.func @mlp_kernel(%arg0: i32, %arg1: memref<2x3072xf32, #tpu.memory_space<vmem>>, %arg2: memref<3072x256xbf16, #tpu.memory_space<vmem>>, %arg3: memref<1x256xf32, #tpu.memory_space<vmem>>, %arg4: memref<256x256xbf16, #tpu.memory_space<vmem>>, %arg5: memref<1x256xf32, #tpu.memory_space<vmem>>, %arg6: memref<256x128xbf16, #tpu.memory_space<vmem>>, %arg7: memref<1x128xf32, #tpu.memory_space<vmem>>, %arg8: memref<2x128xbf16, #tpu.memory_space<vmem>>) attributes {dimension_semantics = [#tpu.dimension_semantics<parallel>], iteration_bounds = array<i64: 1>, scalar_prefetch = 0 : i64, scratch_operands = 0 : i64, tpu.core_type = #tpu.core_type<tc>, window_params = [{transform_indices = @transform_0, window_bounds = array<i64: 2, 3072>}, {pipeline_mode = #tpu.pipeline_mode<synchronous>, transform_indices = @transform_1, window_bounds = array<i64: 3072, 256>}, {pipeline_mode = #tpu.pipeline_mode<synchronous>, transform_indices = @transform_2, window_bounds = array<i64: 1, 256>}, {pipeline_mode = #tpu.pipeline_mode<synchronous>, transform_indices = @transform_3, window_bounds = array<i64: 256, 256>}, {pipeline_mode = #tpu.pipeline_mode<synchronous>, transform_indices = @transform_4, window_bounds = array<i64: 1, 256>}, {pipeline_mode = #tpu.pipeline_mode<synchronous>, transform_indices = @transform_5, window_bounds = array<i64: 256, 128>}, {pipeline_mode = #tpu.pipeline_mode<synchronous>, transform_indices = @transform_6, window_bounds = array<i64: 1, 128>}, {transform_indices = @transform_7, window_bounds = array<i64: 2, 128>}]} {
    %c0 = arith.constant 0 : index
    %c0_0 = arith.constant 0 : index
    %0 = vector.load %arg1[%c0, %c0_0] : memref<2x3072xf32, #tpu.memory_space<vmem>>, vector<2x3072xf32>
    %1 = arith.truncf %0 : vector<2x3072xf32> to vector<2x3072xbf16>
    %c0_1 = arith.constant 0 : index
    %c0_2 = arith.constant 0 : index
    %2 = vector.load %arg2[%c0_1, %c0_2] : memref<3072x256xbf16, #tpu.memory_space<vmem>>, vector<3072x256xbf16>
    %cst = arith.constant dense<0.000000e+00> : vector<2x256xf32>
    %3 = tpu.matmul %1, %2, %cst {dimension_numbers = #tpu.dot_dimension_numbers<[1], [0], [0], [1], [0, 0, 1, 1], [], []>} : vector<2x3072xbf16>, vector<3072x256xbf16>, vector<2x256xf32> -> vector<2x256xf32>
    %c0_3 = arith.constant 0 : index
    %c0_4 = arith.constant 0 : index
    %4 = vector.load %arg3[%c0_3, %c0_4] : memref<1x256xf32, #tpu.memory_space<vmem>>, vector<1x256xf32>
    %5 = vector.broadcast %4 : vector<1x256xf32> to vector<2x256xf32>
    %6 = arith.addf %3, %5 : vector<2x256xf32>
    %cst_5 = arith.constant 0.000000e+00 : f32
    %7 = vector.broadcast %cst_5 : f32 to vector<2x256xf32>
    %8 = arith.maximumf %6, %7 : vector<2x256xf32>
    %9 = arith.truncf %8 : vector<2x256xf32> to vector<2x256xbf16>
    %c0_6 = arith.constant 0 : index
    %c0_7 = arith.constant 0 : index
    %10 = vector.load %arg4[%c0_6, %c0_7] : memref<256x256xbf16, #tpu.memory_space<vmem>>, vector<256x256xbf16>
    %cst_8 = arith.constant dense<0.000000e+00> : vector<2x256xf32>
    %11 = tpu.matmul %9, %10, %cst_8 {dimension_numbers = #tpu.dot_dimension_numbers<[1], [0], [0], [1], [0, 0, 1, 1], [], []>} : vector<2x256xbf16>, vector<256x256xbf16>, vector<2x256xf32> -> vector<2x256xf32>
    %c0_9 = arith.constant 0 : index
    %c0_10 = arith.constant 0 : index
    %12 = vector.load %arg5[%c0_9, %c0_10] : memref<1x256xf32, #tpu.memory_space<vmem>>, vector<1x256xf32>
    %13 = vector.broadcast %12 : vector<1x256xf32> to vector<2x256xf32>
    %14 = arith.addf %11, %13 : vector<2x256xf32>
    %cst_11 = arith.constant 0.000000e+00 : f32
    %15 = vector.broadcast %cst_11 : f32 to vector<2x256xf32>
    %16 = arith.maximumf %14, %15 : vector<2x256xf32>
    %17 = arith.truncf %16 : vector<2x256xf32> to vector<2x256xbf16>
    %c0_12 = arith.constant 0 : index
    %c0_13 = arith.constant 0 : index
    %18 = vector.load %arg6[%c0_12, %c0_13] : memref<256x128xbf16, #tpu.memory_space<vmem>>, vector<256x128xbf16>
    %cst_14 = arith.constant dense<0.000000e+00> : vector<2x128xf32>
    %19 = tpu.matmul %17, %18, %cst_14 {dimension_numbers = #tpu.dot_dimension_numbers<[1], [0], [0], [1], [0, 0, 1, 1], [], []>} : vector<2x256xbf16>, vector<256x128xbf16>, vector<2x128xf32> -> vector<2x128xf32>
    %c0_15 = arith.constant 0 : index
    %c0_16 = arith.constant 0 : index
    %20 = vector.load %arg7[%c0_15, %c0_16] : memref<1x128xf32, #tpu.memory_space<vmem>>, vector<1x128xf32>
    %21 = vector.broadcast %20 : vector<1x128xf32> to vector<2x128xf32>
    %22 = arith.addf %19, %21 : vector<2x128xf32>
    %23 = arith.truncf %22 : vector<2x128xf32> to vector<2x128xbf16>
    %c0_17 = arith.constant 0 : index
    %c0_18 = arith.constant 0 : index
    %24 = vector.load %arg8[%c0_17, %c0_18] : memref<2x128xbf16, #tpu.memory_space<vmem>>, vector<2x128xbf16>
    tpu.vector_store %arg8[%c0_17, %c0_18], %23 {strides = array<i32>} : memref<2x128xbf16, #tpu.memory_space<vmem>>, vector<2x128xbf16>,
    return
  }
  func.func @transform_0(%arg0: i32) -> (i32, i32) {
    %c0_i32 = arith.constant 0 : i32
    %c0_i32_0 = arith.constant 0 : i32
    return %arg0, %c0_i32 : i32, i32
  }
  func.func @transform_1(%arg0: i32) -> (i32, i32) {
    %c0_i32 = arith.constant 0 : i32
    %c0_i32_0 = arith.constant 0 : i32
    %c0_i32_1 = arith.constant 0 : i32
    return %c0_i32, %c0_i32_0 : i32, i32
  }
  func.func @transform_2(%arg0: i32) -> (i32, i32) {
    %c0_i32 = arith.constant 0 : i32
    %c0_i32_0 = arith.constant 0 : i32
    %c0_i32_1 = arith.constant 0 : i32
    return %c0_i32, %c0_i32_0 : i32, i32
  }
  func.func @transform_3(%arg0: i32) -> (i32, i32) {
    %c0_i32 = arith.constant 0 : i32
    %c0_i32_0 = arith.constant 0 : i32
    %c0_i32_1 = arith.constant 0 : i32
    return %c0_i32, %c0_i32_0 : i32, i32
  }
  func.func @transform_4(%arg0: i32) -> (i32, i32) {
    %c0_i32 = arith.constant 0 : i32
    %c0_i32_0 = arith.constant 0 : i32
    %c0_i32_1 = arith.constant 0 : i32
    return %c0_i32, %c0_i32_0 : i32, i32
  }
  func.func @transform_5(%arg0: i32) -> (i32, i32) {
    %c0_i32 = arith.constant 0 : i32
    %c0_i32_0 = arith.constant 0 : i32
    %c0_i32_1 = arith.constant 0 : i32
    return %c0_i32, %c0_i32_0 : i32, i32
  }
  func.func @transform_6(%arg0: i32) -> (i32, i32) {
    %c0_i32 = arith.constant 0 : i32
    %c0_i32_0 = arith.constant 0 : i32
    %c0_i32_1 = arith.constant 0 : i32
    return %c0_i32, %c0_i32_0 : i32, i32
  }
  func.func @transform_7(%arg0: i32) -> (i32, i32) {
    %c0_i32 = arith.constant 0 : i32
    %c0_i32_0 = arith.constant 0 : i32
    return %arg0, %c0_i32 : i32, i32
  }
}

</mosaic_0001>

<bundles_post_ra>
// kernel: tpu_custom_call.1
= control target key start
LH: loop header
LB: loop body
LE: loop exit
PB: predicated region body
PF: predicated region fallthrough
CT: control target
= control target key end

     0   :  { %12 = vsyncpa [#allocation3], 0  ;;  %s5132_s0 = inlined_call_operand.hbm [shape: f32[2,3072], index: 0, kind: input, shape index: {}]   ;;  %s5133_s1 = inlined_call_operand.hbm [shape: bf16[3072,256], index: 1, kind: input, shape index: {}]   ;;  %s5134_s2 = inlined_call_operand.hbm [shape: f32[1,256], index: 2, kind: input, shape index: {}]   ;;  %s5135_s3 = inlined_call_operand.hbm [shape: bf16[256,256], index: 3, kind: input, shape index: {}]   ;;  %s5136_s4 = inlined_call_operand.hbm [shape: f32[1,256], index: 4, kind: input, shape index: {}]   ;;  %s5137_s5 = inlined_call_operand.hbm [shape: bf16[256,128], index: 5, kind: input, shape index: {}]   ;;  %s5138_s6 = inlined_call_operand.hbm [shape: f32[1,128], index: 6, kind: input, shape index: {}]   ;;  %s5139_s7 = inlined_call_operand.hbm [shape: bf16[2,128], index: 7, kind: output, shape index: {}]  }
   0x1   :  { %13 = vsyncpa [#allocation6], 0 }
   0x2   :  { %14 = vsyncpa [#allocation9], 0 }
   0x3   :  { %15 = vsyncpa [#allocation12], 0 }
   0x4   :  { %16 = vsyncpa [#allocation4], 0  ;;  %s4879_s24 = smov [#allocation5]   ;;  %s4693_s28 = scalar_lea.hbm %s5133_s1, 49152 }
   0x5   :  { %s32_s25 = sshll.u32 %s4879_s24, 4  ;;  %p4694_p0 = scmp.ne.s32.totalorder %s5133_s1, %s4693_s28  ;;  %s33_s25 = int_to_ptr.vmem [resolvable:$true] %s32_s25 }
   0x6   :  { %p4697_p1 = scmp.lt.u32.totalorder %s4693_s28, %s5133_s1 }
   0x8   :  { %p4699_p2 = pnand %p4697_p1, %p4694_p0 }
   0xa   :  { %4702 = shalt.err (!%p4699_p2)
}
   0xb   :  { %s4703_s10 = scalar_lea.vmem %s33_s25, 49152  ;;  %p4708_p4 = scmp.lt.s32.totalorder %s33_s25, %s33_s25 }
   0xc   :  { %p4704_p3 = scmp.ne.s32.totalorder %s33_s25, %s4703_s10  ;;  %p4709_p5 = scmp.lt.s32.totalorder %s4703_s10, %s4703_s10 }
   0xe   :  { %p4710_p6 = por %p4709_p5, %p4708_p4 }
  0x10   :  { %p4711_p7 = pnand %p4710_p6, %p4704_p3 }
  0x12   :  { %4714 = shalt.err (!%p4711_p7)
}
  0x13   :  { %s4880_s11 = smov 128   ;;  %s4881_s12 = smov 8  }
  0x14   :  { %38 = dma.hbm_to_vmem [thread:$0]  %s5133_s1, 49152, %s33_s25, [#allocation6], %s4880_s11, %s4880_s11, %s4881_s12  }
  0x15   :  { %s4882_s15 = smov [#allocation8]   ;;  %s4883_s17 = smov [#allocation11]  }
  0x16   :  { %s54_s16 = sshll.u32 %s4882_s15, 4  ;;  %s76_s18 = sshll.u32 %s4883_s17, 4  ;;  %s55_s16 = int_to_ptr.vmem [resolvable:$true] %s54_s16  ;;  %s77_s18 = int_to_ptr.vmem [resolvable:$true] %s76_s18 }
  0x17   :  { %s4715_s21 = scalar_lea.hbm %s5135_s3, 4096 }
  0x18   :  { %p4716_p8 = scmp.ne.s32.totalorder %s5135_s3, %s4715_s21  ;;  %p4719_p9 = scmp.lt.u32.totalorder %s4715_s21, %s5135_s3 }
  0x1a   :  { %p4721_p10 = pnand %p4719_p9, %p4716_p8 }
  0x1c   :  { %4724 = shalt.err (!%p4721_p10)
}
  0x1d   :  { %s4725_s1 = scalar_lea.vmem %s55_s16, 4096  ;;  %p4730_p12 = scmp.lt.s32.totalorder %s55_s16, %s55_s16 }
  0x1e   :  { %p4726_p11 = scmp.ne.s32.totalorder %s55_s16, %s4725_s1  ;;  %p4731_p13 = scmp.lt.s32.totalorder %s4725_s1, %s4725_s1 }
  0x20   :  { %p4732_p0 = por %p4731_p13, %p4730_p12 }
  0x22   :  { %p4733_p1 = pnand %p4732_p0, %p4726_p11 }
  0x24   :  { %4736 = shalt.err (!%p4733_p1)
}
  0x25   :  { %60 = dma.hbm_to_vmem [thread:$0]  %s5135_s3, 4096, %s55_s16, [#allocation9], %s4880_s11, %s4880_s11, %s4881_s12  }
  0x26   :  { %s4737_s30 = scalar_lea.hbm %s5137_s5, 2048 }
  0x27   :  { %p4738_p2 = scmp.ne.s32.totalorder %s5137_s5, %s4737_s30  ;;  %p4741_p3 = scmp.lt.u32.totalorder %s4737_s30, %s5137_s5 }
  0x29   :  { %p4743_p4 = pnand %p4741_p3, %p4738_p2 }
  0x2b   :  { %4746 = shalt.err (!%p4743_p4)
}
  0x2c   :  { %s4747_s14 = scalar_lea.vmem %s77_s18, 2048  ;;  %p4752_p6 = scmp.lt.s32.totalorder %s77_s18, %s77_s18 }
  0x2d   :  { %p4748_p5 = scmp.ne.s32.totalorder %s77_s18, %s4747_s14  ;;  %p4753_p7 = scmp.lt.s32.totalorder %s4747_s14, %s4747_s14 }
  0x2f   :  { %p4754_p8 = por %p4753_p7, %p4752_p6 }
  0x31   :  { %p4755_p9 = pnand %p4754_p8, %p4748_p5 }
  0x33   :  { %4758 = shalt.err (!%p4755_p9)
}
  0x34   :  { %s4884_s3 = smov 64   ;;  %s4885_s11 = smov 4  }
  0x35   :  { %82 = dma.hbm_to_vmem [thread:$0]  %s5137_s5, 2048, %s77_s18, [#allocation12], %s4884_s3, %s4884_s3, %s4885_s11  }
  0x36   :  { %s4886_s16 = smov [#allocation2]   ;;  %s4887_s19 = smov [#allocation7]  }
  0x37   :  { %s23_s17 = sshll.u32 %s4886_s16, 4  ;;  %s45_s20 = sshll.u32 %s4887_s19, 4  ;;  %s24_s17 = int_to_ptr.vmem [resolvable:$true] %s23_s17  ;;  %s46_s20 = int_to_ptr.vmem [resolvable:$true] %s45_s20 }
  0x38   :  { %s4759_s23 = scalar_lea.hbm %s5132_s0, 768 }
  0x39   :  { %p4760_p10 = scmp.ne.s32.totalorder %s5132_s0, %s4759_s23  ;;  %p4763_p11 = scmp.lt.u32.totalorder %s4759_s23, %s5132_s0 }
  0x3b   :  { %p4765_p12 = pnand %p4763_p11, %p4760_p10 }
  0x3d   :  { %4768 = shalt.err (!%p4765_p12)
}
  0x3e   :  { %s4769_s5 = scalar_lea.vmem %s24_s17, 768  ;;  %p4774_p0 = scmp.lt.s32.totalorder %s24_s17, %s24_s17 }
  0x3f   :  { %p4770_p13 = scmp.ne.s32.totalorder %s24_s17, %s4769_s5  ;;  %p4775_p1 = scmp.lt.s32.totalorder %s4769_s5, %s4769_s5 }
  0x41   :  { %p4776_p2 = por %p4775_p1, %p4774_p0 }
  0x43   :  { %p4777_p3 = pnand %p4776_p2, %p4770_p13 }
  0x45   :  { %4780 = shalt.err (!%p4777_p3)
}
  0x46   :  { %26 = dma.hbm_to_vmem [thread:$0]  %s5132_s0, 768, %s24_s17, [#allocation3]  }
  0x47   :  { %s4781_s30 = scalar_lea.hbm %s5134_s2, 32 }
  0x48   :  { %p4782_p4 = scmp.ne.s32.totalorder %s5134_s2, %s4781_s30  ;;  %p4785_p5 = scmp.lt.u32.totalorder %s4781_s30, %s5134_s2 }
  0x4a   :  { %p4787_p6 = pnand %p4785_p5, %p4782_p4 }
  0x4c   :  { %4790 = shalt.err (!%p4787_p6)
}
  0x4d   :  { %s4791_s14 = scalar_lea.vmem %s46_s20, 32  ;;  %p4796_p8 = scmp.lt.s32.totalorder %s46_s20, %s46_s20 }
  0x4e   :  { %p4792_p7 = scmp.ne.s32.totalorder %s46_s20, %s4791_s14  ;;  %p4797_p9 = scmp.lt.s32.totalorder %s4791_s14, %s4791_s14 }
  0x50   :  { %p4798_p10 = por %p4797_p9, %p4796_p8 }
  0x52   :  { %p4799_p11 = pnand %p4798_p10, %p4792_p7 }
  0x54   :  { %4802 = shalt.err (!%p4799_p11)
}
  0x55   :  { %48 = dma.hbm_to_vmem [thread:$0]  %s5134_s2, 32, %s46_s20, [#allocation6]  }
  0x56   :  { %s4888_s11 = smov [#allocation10]   ;;  %s4889_s15 = smov [#allocation13]  }
  0x57   :  { %s67_s12 = sshll.u32 %s4888_s11, 4  ;;  %s89_s16 = sshll.u32 %s4889_s15, 4  ;;  %s68_s12 = int_to_ptr.vmem [resolvable:$true] %s67_s12  ;;  %s90_s16 = int_to_ptr.vmem [resolvable:$true] %s89_s16 }
  0x58   :  { %s4803_s21 = scalar_lea.hbm %s5136_s4, 32 }
  0x59   :  { %p4804_p12 = scmp.ne.s32.totalorder %s5136_s4, %s4803_s21  ;;  %p4807_p13 = scmp.lt.u32.totalorder %s4803_s21, %s5136_s4 }
  0x5b   :  { %p4809_p0 = pnand %p4807_p13, %p4804_p12 }
  0x5d   :  { %4812 = shalt.err (!%p4809_p0)
}
  0x5e   :  { %s4813_s2 = scalar_lea.vmem %s68_s12, 32  ;;  %p4818_p2 = scmp.lt.s32.totalorder %s68_s12, %s68_s12 }
  0x5f   :  { %p4814_p1 = scmp.ne.s32.totalorder %s68_s12, %s4813_s2  ;;  %p4819_p3 = scmp.lt.s32.totalorder %s4813_s2, %s4813_s2 }
  0x61   :  { %p4820_p4 = por %p4819_p3, %p4818_p2 }
  0x63   :  { %p4821_p5 = pnand %p4820_p4, %p4814_p1 }
  0x65   :  { %4824 = shalt.err (!%p4821_p5)
}
  0x66   :  { %70 = dma.hbm_to_vmem [thread:$0]  %s5136_s4, 32, %s68_s12, [#allocation9]  }
  0x67   :  { %s4825_s18 = scalar_lea.hbm %s5138_s6, 16 }
  0x68   :  { %p4826_p6 = scmp.ne.s32.totalorder %s5138_s6, %s4825_s18  ;;  %p4829_p7 = scmp.lt.u32.totalorder %s4825_s18, %s5138_s6 }
  0x6a   :  { %p4831_p8 = pnand %p4829_p7, %p4826_p6 }
  0x6c   :  { %4834 = shalt.err (!%p4831_p8)
}
  0x6d   :  { %s4835_s8 = scalar_lea.vmem %s90_s16, 16  ;;  %s4839_s9 = scalar_lea.vmem %s90_s16, 32 }
  0x6e   :  { %p4836_p9 = scmp.ne.s32.totalorder %s90_s16, %s4835_s8  ;;  %p4840_p10 = scmp.lt.s32.totalorder %s90_s16, %s90_s16 }
  0x6f   :  { %p4841_p11 = scmp.lt.s32.totalorder %s4839_s9, %s4835_s8 }
  0x71   :  { %p4842_p12 = por %p4841_p11, %p4840_p10 }
  0x73   :  { %p4843_p13 = pnand %p4842_p12, %p4836_p9 }
  0x75   :  { %4846 = shalt.err (!%p4843_p13)
}
  0x76   :  { %92 = dma.hbm_to_vmem [thread:$0]  %s5138_s6, 16, %s90_s16, [#allocation12]  }
  0x77   :  { %4869 = dma.done.wait [#allocation3], 768  }
  0x78   :  { %4870 = vsyncadd [#allocation3], 4294966528 }
  0x79   :  { %4871 = dma.done.wait [#allocation6], 49184  }
  0x7a   :  { %4872 = vsyncadd [#allocation6], 4294918112 }
  0x7b   :  { %4873 = dma.done.wait [#allocation9], 4128  }
  0x7c   :  { %4874 = vsyncadd [#allocation9], 4294963168 }
  0x7d   :  { %4875 = dma.done.wait [#allocation12], 2064  }
  0x7e   :  { %4876 = vsyncadd [#allocation12], 4294965232  ;;  %v4045_v0 = vld [vmem:[#allocation5 + $0x4] ss:$8 sps:$4 sm:$0xff]   ;;  %v4049_v2 = vld [vmem:[#allocation5] ss:$8 sps:$4 sm:$0xff]   ;;  %v131_v38 = vlaneseq }
  0x7f   :  { %v4047_v1 = vld [vmem:[#allocation5 + $0x504] ss:$8 sps:$4 sm:$0xff]   ;;  %2593 = vmatprep.subr.bf16.mxu1 %v4045_v0  ;;  %v4050_v3 = vld [vmem:[#allocation5 + $0x500] ss:$8 sps:$4 sm:$0xff]   ;;  %v4051_v4 = vld [vmem:[#allocation5 + $0x14] ss:$8 sps:$4 sm:$0xff]  }
  0x80   :  { %2798 = vmatprep.subr.bf16.mxu0 %v4047_v1  ;;  %2594 = vmatpush1.bf16.msra.mxu1 %v4049_v2  ;;  %v4053_v5 = vld [vmem:[#allocation5 + $0x514] ss:$8 sps:$4 sm:$0xff]   ;;  %v4055_v6 = vld [vmem:[#allocation5 + $0x10] ss:$8 sps:$4 sm:$0xff]   ;;  %v4057_v8 = vld [vmem:[#allocation5 + $0x24] ss:$8 sps:$4 sm:$0xff]  }
  0x81   :  { %2799 = vmatpush1.bf16.msra.mxu0 %v4050_v3  ;;  %2595 = vmatprep.subr.bf16.mxu1 %v4051_v4  ;;  %v4056_v7 = vld [vmem:[#allocation5 + $0x510] ss:$8 sps:$4 sm:$0xff]   ;;  %v4059_v9 = vld [vmem:[#allocation5 + $0x524] ss:$8 sps:$4 sm:$0xff]   ;;  %v4061_v10 = vld [vmem:[#allocation5 + $0x20] ss:$8 sps:$4 sm:$0xff]  }
  0x82   :  { %2800 = vmatprep.subr.bf16.mxu0 %v4053_v5  ;;  %v4062_v11 = vld [vmem:[#allocation5 + $0x520] ss:$8 sps:$4 sm:$0xff]   ;;  %v4063_v12 = vld [vmem:[#allocation5 + $0x34] ss:$8 sps:$4 sm:$0xff]   ;;  %v4067_v14 = vld [vmem:[#allocation5 + $0x30] ss:$8 sps:$4 sm:$0xff]  }
  0x83   :  { %v4065_v13 = vld [vmem:[#allocation5 + $0x534] ss:$8 sps:$4 sm:$0xff]   ;;  %v4068_v15 = vld [vmem:[#allocation5 + $0x530] ss:$8 sps:$4 sm:$0xff]   ;;  %v4069_v16 = vld [vmem:[#allocation5 + $0x44] ss:$8 sps:$4 sm:$0xff]  }
  0x84   :  { %2596 = vmatpush1.bf16.msra.mxu1 %v4055_v6  ;;  %v4071_v17 = vld [vmem:[#allocation5 + $0x544] ss:$8 sps:$4 sm:$0xff]   ;;  %v4073_v18 = vld [vmem:[#allocation5 + $0x40] ss:$8 sps:$4 sm:$0xff]   ;;  %v4075_v20 = vld [vmem:[#allocation5 + $0x54] ss:$8 sps:$4 sm:$0xff]  }
  0x85   :  { %2801 = vmatpush1.bf16.msra.mxu0 %v4056_v7  ;;  %2597 = vmatprep.subr.bf16.mxu1 %v4057_v8  ;;  %v4074_v19 = vld [vmem:[#allocation5 + $0x540] ss:$8 sps:$4 sm:$0xff]   ;;  %v4077_v21 = vld [vmem:[#allocation5 + $0x554] ss:$8 sps:$4 sm:$0xff]   ;;  %v4079_v22 = vld [vmem:[#allocation5 + $0x50] ss:$8 sps:$4 sm:$0xff]  }
  0x86   :  { %2802 = vmatprep.subr.bf16.mxu0 %v4059_v9  ;;  %v4080_v23 = vld [vmem:[#allocation5 + $0x550] ss:$8 sps:$4 sm:$0xff]   ;;  %v4081_v24 = vld [vmem:[#allocation5 + $0x64] ss:$8 sps:$4 sm:$0xff]   ;;  %v4085_v26 = vld [vmem:[#allocation5 + $0x60] ss:$8 sps:$4 sm:$0xff]  }
  0x87   :  { %v4083_v25 = vld [vmem:[#allocation5 + $0x564] ss:$8 sps:$4 sm:$0xff]   ;;  %v4086_v27 = vld [vmem:[#allocation5 + $0x560] ss:$8 sps:$4 sm:$0xff]   ;;  %v4087_v28 = vld [vmem:[#allocation5 + $0x74] ss:$8 sps:$4 sm:$0xff]  }
  0x88   :  { %2598 = vmatpush1.bf16.msra.mxu1 %v4061_v10  ;;  %v4089_v29 = vld [vmem:[#allocation5 + $0x574] ss:$8 sps:$4 sm:$0xff]   ;;  %v4091_v30 = vld [vmem:[#allocation5 + $0x70] ss:$8 sps:$4 sm:$0xff]   ;;  %v4093_v32 = vld [vmem:[#allocation5 + $0x84] ss:$8 sps:$4 sm:$0xff]  }
  0x89   :  { %2803 = vmatpush1.bf16.msra.mxu0 %v4062_v11  ;;  %2599 = vmatprep.subr.bf16.mxu1 %v4063_v12  ;;  %v4092_v31 = vld [vmem:[#allocation5 + $0x570] ss:$8 sps:$4 sm:$0xff]   ;;  %v4095_v33 = vld [vmem:[#allocation5 + $0x584] ss:$8 sps:$4 sm:$0xff]   ;;  %v4097_v34 = vld [vmem:[#allocation5 + $0x80] ss:$8 sps:$4 sm:$0xff]  }
  0x8a   :  { %2804 = vmatprep.subr.bf16.mxu0 %v4065_v13  ;;  %v4098_v35 = vld [vmem:[#allocation5 + $0x580] ss:$8 sps:$4 sm:$0xff]   ;;  %v4890_v36 = vmov 1983009808   ;;  %v4099_v39 = vld [vmem:[#allocation5 + $0x94] ss:$8 sps:$4 sm:$0xff]  }
  0x8b   :  { %v129_v37 = vunpack.c.l.s4 %v4890_v36  ;;  %v4101_v40 = vld [vmem:[#allocation5 + $0x594] ss:$8 sps:$4 sm:$0xff]   ;;  %v4103_v41 = vld [vmem:[#allocation5 + $0x90] ss:$8 sps:$4 sm:$0xff]   ;;  %v5016_v43 = vshrl.u32 %v131_v38, 7  ;;  %v117_v56 = vld [vmem:[#allocation2 + $0x10] sm:$0xff] }
  0x8c   :  { %2600 = vmatpush1.bf16.msra.mxu1 %v4067_v14  ;;  %v4104_v44 = vld [vmem:[#allocation5 + $0x590] ss:$8 sps:$4 sm:$0xff]   ;;  %v4105_v45 = vld [vmem:[#allocation5 + $0xa4] ss:$8 sps:$4 sm:$0xff]   ;;  %v4109_v47 = vld [vmem:[#allocation5 + $0xa0] ss:$8 sps:$4 sm:$0xff]   ;;  %v161_v60 = vcombine.high %v117_v56, %v117_v56 }
  0x8d   :  { %2805 = vmatpush1.bf16.msra.mxu0 %v4068_v15  ;;  %2601 = vmatprep.subr.bf16.mxu1 %v4069_v16  ;;  %v130_v42 = vunpack.c.0.s8 %v129_v37  ;;  %v4107_v46 = vld [vmem:[#allocation5 + $0x5a4] ss:$8 sps:$4 sm:$0xff]   ;;  %v4110_v48 = vld [vmem:[#allocation5 + $0x5a0] ss:$8 sps:$4 sm:$0xff]   ;;  %v4111_v50 = vld [vmem:[#allocation5 + $0xb4] ss:$8 sps:$4 sm:$0xff]  }
  0x8e   :  { %2806 = vmatprep.subr.bf16.mxu0 %v4071_v17  ;;  %v4113_v51 = vld [vmem:[#allocation5 + $0x5b4] ss:$8 sps:$4 sm:$0xff]   ;;  %v4115_v53 = vld [vmem:[#allocation5 + $0xb0] ss:$8 sps:$4 sm:$0xff]   ;;  %v4117_v57 = vld [vmem:[#allocation5 + $0xc4] ss:$8 sps:$4 sm:$0xff]  }
  0x8f   :  { %v5019_v49 = vsub.s32 %v130_v42, %v5016_v43  ;;  %v115_v52 = vld [vmem:[#allocation2] sm:$0xff]  ;;  %v4119_v58 = vld [vmem:[#allocation5 + $0x5c4] ss:$8 sps:$4 sm:$0xff]   ;;  %v4121_v63 = vld [vmem:[#allocation5 + $0xc0] ss:$8 sps:$4 sm:$0xff]   ;;  %s4891_s6 = smov [#allocation14]  }
  0x90   :  { %2602 = vmatpush1.bf16.msra.mxu1 %v4073_v18  ;;  %v4116_v55 = vld [vmem:[#allocation5 + $0x5b0] ss:$8 sps:$4 sm:$0xff]   ;;  %v4122_v0 = vld [vmem:[#allocation5 + $0x5c0] ss:$8 sps:$4 sm:$0xff]   ;;  %v4123_v1 = vld [vmem:[#allocation5 + $0xd4] ss:$8 sps:$4 sm:$0xff]   ;;  %v127_v9 = vcombine.high %v115_v52, %v115_v52 }
  0x91   :  { %2807 = vmatpush1.bf16.msra.mxu0 %v4074_v19  ;;  %2603 = vmatprep.subr.bf16.mxu1 %v4075_v20  ;;  %v5022_v54 = vrot.slane %v115_v52, %v5019_v49  ;;  %v175_v62 = vrot.slane %v161_v60, %v5019_v49  ;;  %v4125_v2 = vld [vmem:[#allocation5 + $0x5d4] ss:$8 sps:$4 sm:$0xff]   ;;  %v4127_v5 = vld [vmem:[#allocation5 + $0xd0] ss:$8 sps:$4 sm:$0xff]   ;;  %v4129_v7 = vld [vmem:[#allocation5 + $0xe4] ss:$8 sps:$4 sm:$0xff]  }
  0x92   :  { %2808 = vmatprep.subr.bf16.mxu0 %v4077_v21  ;;  %v4128_v6 = vld [vmem:[#allocation5 + $0x5d0] ss:$8 sps:$4 sm:$0xff]   ;;  %v4131_v8 = vld [vmem:[#allocation5 + $0x5e4] ss:$8 sps:$4 sm:$0xff]   ;;  %v4133_v10 = vld [vmem:[#allocation5 + $0xe0] ss:$8 sps:$4 sm:$0xff]   ;;  %v5028_v14 = vrot.slane %v127_v9, %v5019_v49 }
  0x93   :  { %v142_v59 = vcombine.high %v5022_v54, %v5022_v54  ;;  %v177_v3 = vcombine.high %v175_v62, %v175_v62  ;;  %v4134_v11 = vld [vmem:[#allocation5 + $0x5e0] ss:$8 sps:$4 sm:$0xff]   ;;  %v4135_v12 = vld [vmem:[#allocation5 + $0xf4] ss:$8 sps:$4 sm:$0xff]   ;;  %v4139_v15 = vld [vmem:[#allocation5 + $0xf0] ss:$8 sps:$4 sm:$0xff]   ;;  %v253_v20 = vpack.c.bf16 %v5022_v54, %v5022_v54  ;;  %v263_v21 = vpack.c.bf16 %v175_v62, %v175_v62 }
  0x94   :  { %2604 = vmatpush1.bf16.msra.mxu1 %v4079_v22  ;;  %v4137_v13 = vld [vmem:[#allocation5 + $0x5f4] ss:$8 sps:$4 sm:$0xff]   ;;  %v4140_v16 = vld [vmem:[#allocation5 + $0x5f0] ss:$8 sps:$4 sm:$0xff]   ;;  %v4144_v17 = vld [vmem:[#allocation5 + $0x104] ss:$8 sps:$4 sm:$0xff]   ;;  %v143_v19 = vcombine.high %v5028_v14, %v5028_v14 }
  0x95   :  { %2809 = vmatpush1.bf16.msra.mxu0 %v4080_v23  ;;  %2605 = vmatprep.subr.bf16.mxu1 %v4081_v24  ;;  %v254_v61 = vpack.c.bf16 %v142_v59, %v142_v59  ;;  %v264_v4 = vpack.c.bf16 %v177_v3, %v177_v3  ;;  %v4148_v18 = vld [vmem:[#allocation5 + $0x604] ss:$8 sps:$4 sm:$0xff]   ;;  %v4142_v22 = vld [vmem:[#allocation5 + $0x100] ss:$8 sps:$4 sm:$0xff]   ;;  %v4151_v24 = vld [vmem:[#allocation5 + $0x114] ss:$8 sps:$4 sm:$0xff]  }
  0x96   :  { %2810 = vmatprep.subr.bf16.mxu0 %v4083_v25  ;;  %v4146_v23 = vld [vmem:[#allocation5 + $0x600] ss:$8 sps:$4 sm:$0xff]   ;;  %v4154_v25 = vld [vmem:[#allocation5 + $0x614] ss:$8 sps:$4 sm:$0xff]   ;;  %v4164_v36 = vld [vmem:[#allocation5 + $0x630] ss:$8 sps:$4 sm:$0xff]  }
  0x97   :  { %2625 = vmatprep.mubr.bf16.mxu1 %v254_v61  ;;  %2830 = vmatprep.mubr.bf16.mxu0 %v264_v4  ;;  %v4169_v37 = vld [vmem:[#allocation5 + $0x144] ss:$8 sps:$4 sm:$0xff]   ;;  %v4178_v42 = vld [vmem:[#allocation5 + $0x654] ss:$8 sps:$4 sm:$0xff]   ;;  %v4185_v56 = vld [vmem:[#allocation5 + $0x170] ss:$8 sps:$4 sm:$0xff]  }
  0x98   :  { %2606 = vmatpush1.bf16.msra.mxu1 %v4085_v26  ;;  %v256_v26 = vpack.c.bf16 %v143_v19, %v143_v19  ;;  %v4172_v38 = vld [vmem:[#allocation5 + $0x644] ss:$8 sps:$4 sm:$0xff]   ;;  %v4187_v52 = vld [vmem:[#allocation5 + $0x174] ss:$8 sps:$4 sm:$0xff]   ;;  %v4191_v61 = vld [vmem:[#allocation5 + $0x180] ss:$8 sps:$4 sm:$0xff]  }
  0x99   :  { %2811 = vmatpush1.bf16.msra.mxu0 %v4086_v27  ;;  %2607 = vmatprep.subr.bf16.mxu1 %v4087_v28  ;;  %v4149_v27 = vld [vmem:[#allocation5 + $0x110] ss:$8 sps:$4 sm:$0xff]   ;;  %v4190_v54 = vld [vmem:[#allocation5 + $0x674] ss:$8 sps:$4 sm:$0xff]   ;;  %v4196_v60 = vld [vmem:[#allocation5 + $0x684] ss:$8 sps:$4 sm:$0xff]  }
  0x9a   :  { %2812 = vmatprep.subr.bf16.mxu0 %v4089_v29  ;;  %v4152_v28 = vld [vmem:[#allocation5 + $0x610] ss:$8 sps:$4 sm:$0xff]   ;;  %v4157_v29 = vld [vmem:[#allocation5 + $0x124] ss:$8 sps:$4 sm:$0xff]   ;;  %v4194_v62 = vld [vmem:[#allocation5 + $0x680] ss:$8 sps:$4 sm:$0xff]  }
  0x9b   :  { %v4205_v3 = vld [vmem:[#allocation5 + $0x1a4] ss:$8 sps:$4 sm:$0xff]   ;;  %v4209_v9 = vld [vmem:[#allocation5 + $0x1b0] ss:$8 sps:$4 sm:$0xff]   ;;  %s3521_s13 = sshll.u32 %s4891_s6, 4  ;;  %s3522_s13 = int_to_ptr.vmem [resolvable:$true] %s3521_s13 }
  0x9c   :  { %2608 = vmatpush1.bf16.msra.mxu1 %v4091_v30  ;;  %v4160_v30 = vld [vmem:[#allocation5 + $0x624] ss:$8 sps:$4 sm:$0xff]   ;;  %v4224_v19 = vld [vmem:[#allocation5 + $0x6d0] ss:$8 sps:$4 sm:$0xff]   ;;  %s4847_s14 = scalar_lea.vmem %s3522_s13, 16  ;;  %s4851_s0 = scalar_lea.vmem %s3522_s13, 32 }
  0x9d   :  { %2813 = vmatpush1.bf16.msra.mxu0 %v4092_v31  ;;  %2609 = vmatprep.subr.bf16.mxu1 %v4093_v32  ;;  %v4155_v31 = vld [vmem:[#allocation5 + $0x120] ss:$8 sps:$4 sm:$0xff]   ;;  %v4208_v4 = vld [vmem:[#allocation5 + $0x6a4] ss:$8 sps:$4 sm:$0xff]   ;;  %p4848_p0 = scmp.ne.s32.totalorder %s3522_s13, %s4847_s14  ;;  %p4852_p1 = scmp.lt.s32.totalorder %s3522_s13, %s3522_s13 }
  0x9e   :  { %2814 = vmatprep.subr.bf16.mxu0 %v4095_v33  ;;  %v4158_v32 = vld [vmem:[#allocation5 + $0x620] ss:$8 sps:$4 sm:$0xff]   ;;  %v4163_v33 = vld [vmem:[#allocation5 + $0x134] ss:$8 sps:$4 sm:$0xff]   ;;  %p4853_p2 = scmp.lt.s32.totalorder %s4851_s0, %s4847_s14 }
  0xa0   :  { %2610 = vmatpush1.bf16.msra.mxu1 %v4097_v34  ;;  %v4166_v34 = vld [vmem:[#allocation5 + $0x634] ss:$8 sps:$4 sm:$0xff]   ;;  %p4854_p3 = por %p4853_p2, %p4852_p1 }
  0xa1   :  { %2815 = vmatpush1.bf16.msra.mxu0 %v4098_v35  ;;  %2611 = vmatprep.subr.bf16.mxu1 %v4099_v39  ;;  %v4161_v35 = vld [vmem:[#allocation5 + $0x130] ss:$8 sps:$4 sm:$0xff]   ;;  %v4167_v39 = vld [vmem:[#allocation5 + $0x140] ss:$8 sps:$4 sm:$0xff]  }
  0xa2   :  { %2816 = vmatprep.subr.bf16.mxu0 %v4101_v40  ;;  %v4170_v40 = vld [vmem:[#allocation5 + $0x640] ss:$8 sps:$4 sm:$0xff]   ;;  %p4855_p4 = pnand %p4854_p3, %p4848_p0 }
  0xa4   :  { %2612 = vmatpush1.bf16.msra.mxu1 %v4103_v41  ;;  %v4175_v41 = vld [vmem:[#allocation5 + $0x154] ss:$8 sps:$4 sm:$0xff]  }
  0xa5   :  { %2817 = vmatpush1.bf16.msra.mxu0 %v4104_v44  ;;  %2613 = vmatprep.subr.bf16.mxu1 %v4105_v45  ;;  %v4173_v44 = vld [vmem:[#allocation5 + $0x150] ss:$8 sps:$4 sm:$0xff]  }
  0xa6   :  { %2818 = vmatprep.subr.bf16.mxu0 %v4107_v46  ;;  %v4176_v45 = vld [vmem:[#allocation5 + $0x650] ss:$8 sps:$4 sm:$0xff]   ;;  %v4181_v46 = vld [vmem:[#allocation5 + $0x164] ss:$8 sps:$4 sm:$0xff]  }
  0xa8   :  { %2614 = vmatpush1.bf16.msra.mxu1 %v4109_v47  ;;  %v4184_v47 = vld [vmem:[#allocation5 + $0x664] ss:$8 sps:$4 sm:$0xff]  }
  0xa9   :  { %2819 = vmatpush1.bf16.msra.mxu0 %v4110_v48  ;;  %2615 = vmatprep.subr.bf16.mxu1 %v4111_v50  ;;  %v4179_v48 = vld [vmem:[#allocation5 + $0x160] ss:$8 sps:$4 sm:$0xff]  }
  0xaa   :  { %2820 = vmatprep.subr.bf16.mxu0 %v4113_v51  ;;  %v5034_v50 = vld [vmem:[#allocation2 + $0x18] sm:$0xff] }
  0xab   :  { %v4182_v51 = vld [vmem:[#allocation5 + $0x660] ss:$8 sps:$4 sm:$0xff]  }
  0xac   :  { %2616 = vmatpush1.bf16.msra.mxu1 %v4115_v53  ;;  %v5038_v53 = vrot.slane %v5034_v50, %v5019_v49 }
  0xad   :  { %2821 = vmatpush1.bf16.msra.mxu0 %v4116_v55  ;;  %2617 = vmatprep.subr.bf16.mxu1 %v4117_v57  ;;  %v4188_v57 = vld [vmem:[#allocation5 + $0x670] ss:$8 sps:$4 sm:$0xff]  }
  0xae   :  { %2822 = vmatprep.subr.bf16.mxu0 %v4119_v58  ;;  %v193_v55 = vcombine.high %v5038_v53, %v5038_v53  ;;  %v4193_v58 = vld [vmem:[#allocation5 + $0x184] ss:$8 sps:$4 sm:$0xff]  }
  0xb0   :  { %2618 = vmatpush1.bf16.msra.mxu1 %v4121_v63  ;;  %v266_v59 = vpack.c.bf16 %v193_v55, %v193_v55  ;;  %v4199_v63 = vld [vmem:[#allocation5 + $0x194] ss:$8 sps:$4 sm:$0xff]   ;;  %v4265_v55 = vld [vmem:[#allocation5 + $0x244] ss:$8 sps:$4 sm:$0xff]  }
  0xb1   :  { %2823 = vmatpush1.bf16.msra.mxu0 %v4122_v0  ;;  %2619 = vmatprep.subr.bf16.mxu1 %v4123_v1  ;;  %v4202_v0 = vld [vmem:[#allocation5 + $0x694] ss:$8 sps:$4 sm:$0xff]   ;;  %v4197_v1 = vld [vmem:[#allocation5 + $0x190] ss:$8 sps:$4 sm:$0xff]  }
  0xb2   :  { %2824 = vmatprep.subr.bf16.mxu0 %v4125_v2  ;;  %v4200_v2 = vld [vmem:[#allocation5 + $0x690] ss:$8 sps:$4 sm:$0xff]  }
  0xb4   :  { %2620 = vmatpush1.bf16.msra.mxu1 %v4127_v5  ;;  %v4203_v5 = vld [vmem:[#allocation5 + $0x1a0] ss:$8 sps:$4 sm:$0xff]  }
  0xb5   :  { %2825 = vmatpush1.bf16.msra.mxu0 %v4128_v6  ;;  %2621 = vmatprep.subr.bf16.mxu1 %v4129_v7  ;;  %v4206_v6 = vld [vmem:[#allocation5 + $0x6a0] ss:$8 sps:$4 sm:$0xff]   ;;  %v4211_v7 = vld [vmem:[#allocation5 + $0x1b4] ss:$8 sps:$4 sm:$0xff]  }
  0xb6   :  { %2826 = vmatprep.subr.bf16.mxu0 %v4131_v8  ;;  %v4214_v8 = vld [vmem:[#allocation5 + $0x6b4] ss:$8 sps:$4 sm:$0xff]  }
  0xb8   :  { %2622 = vmatpush1.bf16.msra.mxu1 %v4133_v10  ;;  %v4212_v10 = vld [vmem:[#allocation5 + $0x6b0] ss:$8 sps:$4 sm:$0xff]  }
  0xb9   :  { %2827 = vmatpush1.bf16.msra.mxu0 %v4134_v11  ;;  %2623 = vmatprep.subr.bf16.mxu1 %v4135_v12  ;;  %v4217_v11 = vld [vmem:[#allocation5 + $0x1c4] ss:$8 sps:$4 sm:$0xff]  }
  0xba   :  { %2828 = vmatprep.subr.bf16.mxu0 %v4137_v13  ;;  %v4220_v12 = vld [vmem:[#allocation5 + $0x6c4] ss:$8 sps:$4 sm:$0xff]   ;;  %v4215_v13 = vld [vmem:[#allocation5 + $0x1c0] ss:$8 sps:$4 sm:$0xff]  }
  0xbc   :  { %2624 = vmatpush1.bf16.msra.mxu1 %v4139_v15  ;;  %v4218_v15 = vld [vmem:[#allocation5 + $0x6c0] ss:$8 sps:$4 sm:$0xff]  }
  0xbd   :  { %2829 = vmatpush1.bf16.msra.mxu0 %v4140_v16  ;;  %2634 = vmatprep.subr.bf16.mxu1 %v4144_v17  ;;  %v4223_v16 = vld [vmem:[#allocation5 + $0x1d4] ss:$8 sps:$4 sm:$0xff]  }
  0xbe   :  { %2839 = vmatprep.subr.bf16.mxu0 %v4148_v18  ;;  %v4226_v17 = vld [vmem:[#allocation5 + $0x6d4] ss:$8 sps:$4 sm:$0xff]   ;;  %v4221_v18 = vld [vmem:[#allocation5 + $0x1d0] ss:$8 sps:$4 sm:$0xff]  }
  0xbf   :  { %2626 = vmatmul.mubr.bf16.vlgmr.msra.gmra.mrb[0].mxu1 %v253_v20  ;;  %v4229_v20 = vld [vmem:[#allocation5 + $0x1e4] ss:$8 sps:$4 sm:$0xff]  }
  0xc0   :  { %2831 = vmatmul.mubr.bf16.vlgmr.msra.gmra.mrb[0].mxu0 %v263_v21  ;;  %2635 = vmatpush1.bf16.msra.mxu1 %v4142_v22  ;;  %v4232_v21 = vld [vmem:[#allocation5 + $0x6e4] ss:$8 sps:$4 sm:$0xff]   ;;  %v178_v22 = vcombine.high %v5034_v50, %v5034_v50  ;;  %v4254_v50 = vld [vmem:[#allocation5 + $0x720] ss:$8 sps:$4 sm:$0xff]  }
  0xc1   :  { %2840 = vmatpush1.bf16.msra.mxu0 %v4146_v23  ;;  %2636 = vmatprep.subr.bf16.mxu1 %v4151_v24  ;;  %v4227_v23 = vld [vmem:[#allocation5 + $0x1e0] ss:$8 sps:$4 sm:$0xff]  }
  0xc2   :  { %2841 = vmatprep.subr.bf16.mxu0 %v4154_v25  ;;  %2666 = vmatprep.mubr.bf16.mxu1 %v256_v26  ;;  %v4230_v24 = vld [vmem:[#allocation5 + $0x6e0] ss:$8 sps:$4 sm:$0xff]   ;;  %v4235_v25 = vld [vmem:[#allocation5 + $0x1f4] ss:$8 sps:$4 sm:$0xff]  }
  0xc3   :  { %2871 = vmatprep.mubr.bf16.mxu0 %v266_v59  ;;  %v4238_v26 = vld [vmem:[#allocation5 + $0x6f4] ss:$8 sps:$4 sm:$0xff]  }
  0xc4   :  { %2637 = vmatpush1.bf16.msra.mxu1 %v4149_v27  ;;  %v5045_v27 = vrot.slane %v178_v22, %v5019_v49  ;;  %v4271_v59 = vld [vmem:[#allocation5 + $0x254] ss:$8 sps:$4 sm:$0xff]   ;;  %v4305_v22 = vld [vmem:[#allocation5 + $0x2b0] ss:$8 sps:$4 sm:$0xff]  }
  0xc5   :  { %2842 = vmatpush1.bf16.msra.mxu0 %v4152_v28  ;;  %2638 = vmatprep.subr.bf16.mxu1 %v4157_v29  ;;  %v4233_v28 = vld [vmem:[#allocation5 + $0x1f0] ss:$8 sps:$4 sm:$0xff]  }
  0xc6   :  { %2843 = vmatprep.subr.bf16.mxu0 %v4160_v30  ;;  %v4236_v29 = vld [vmem:[#allocation5 + $0x6f0] ss:$8 sps:$4 sm:$0xff]   ;;  %v4241_v30 = vld [vmem:[#allocation5 + $0x204] ss:$8 sps:$4 sm:$0xff]  }
  0xc8   :  { %2639 = vmatpush1.bf16.msra.mxu1 %v4155_v31  ;;  %v4244_v31 = vld [vmem:[#allocation5 + $0x704] ss:$8 sps:$4 sm:$0xff]  }
  0xc9   :  { %2844 = vmatpush1.bf16.msra.mxu0 %v4158_v32  ;;  %2640 = vmatprep.subr.bf16.mxu1 %v4163_v33  ;;  %v194_v32 = vcombine.high %v5045_v27, %v5045_v27  ;;  %v4239_v33 = vld [vmem:[#allocation5 + $0x200] ss:$8 sps:$4 sm:$0xff]  }
  0xca   :  { %2845 = vmatprep.subr.bf16.mxu0 %v4166_v34  ;;  %v4242_v34 = vld [vmem:[#allocation5 + $0x700] ss:$8 sps:$4 sm:$0xff]  }
  0xcc   :  { %2641 = vmatpush1.bf16.msra.mxu1 %v4161_v35  ;;  %v255_v35 = vpack.c.bf16 %v5028_v14, %v5028_v14  ;;  %v4248_v14 = vld [vmem:[#allocation5 + $0x710] ss:$8 sps:$4 sm:$0xff]  }
  0xcd   :  { %2846 = vmatpush1.bf16.msra.mxu0 %v4164_v36  ;;  %2642 = vmatprep.subr.bf16.mxu1 %v4169_v37  ;;  %v265_v36 = vpack.c.bf16 %v5038_v53, %v5038_v53  ;;  %v4247_v37 = vld [vmem:[#allocation5 + $0x214] ss:$8 sps:$4 sm:$0xff]   ;;  %v4257_v53 = vld [vmem:[#allocation5 + $0x230] ss:$8 sps:$4 sm:$0xff]  }
  0xce   :  { %2847 = vmatprep.subr.bf16.mxu0 %v4172_v38  ;;  %v4250_v38 = vld [vmem:[#allocation5 + $0x714] ss:$8 sps:$4 sm:$0xff]  }
  0xd0   :  { %2643 = vmatpush1.bf16.msra.mxu1 %v4167_v39  ;;  %v5053_v39 = vld [vmem:[#allocation2 + $0x8] sm:$0xff] }
  0xd1   :  { %2848 = vmatpush1.bf16.msra.mxu0 %v4170_v40  ;;  %2644 = vmatprep.subr.bf16.mxu1 %v4175_v41  ;;  %v5057_v40 = vrot.slane %v5053_v39, %v5019_v49  ;;  %v268_v41 = vpack.c.bf16 %v194_v32, %v194_v32  ;;  %v4320_v32 = vld [vmem:[#allocation5 + $0x7d0] ss:$8 sps:$4 sm:$0xff]  }
  0xd2   :  { %2849 = vmatprep.subr.bf16.mxu0 %v4178_v42  ;;  %v4245_v42 = vld [vmem:[#allocation5 + $0x210] ss:$8 sps:$4 sm:$0xff]  }
  0xd4   :  { %2645 = vmatpush1.bf16.msra.mxu1 %v4173_v44  ;;  %v4253_v44 = vld [vmem:[#allocation5 + $0x224] ss:$8 sps:$4 sm:$0xff]  }
  0xd5   :  { %2850 = vmatpush1.bf16.msra.mxu0 %v4176_v45  ;;  %2646 = vmatprep.subr.bf16.mxu1 %v4181_v46  ;;  %v159_v45 = vcombine.high %v5057_v40, %v5057_v40  ;;  %v4256_v46 = vld [vmem:[#allocation5 + $0x724] ss:$8 sps:$4 sm:$0xff]  }
  0xd6   :  { %2851 = vmatprep.subr.bf16.mxu0 %v4184_v47 }
  0xd7   :  { %v258_v47 = vpack.c.bf16 %v159_v45, %v159_v45  ;;  %v4329_v45 = vld [vmem:[#allocation5 + $0x2f0] ss:$8 sps:$4 sm:$0xff]  }
  0xd8   :  { %2647 = vmatpush1.bf16.msra.mxu1 %v4179_v48  ;;  %v4251_v48 = vld [vmem:[#allocation5 + $0x220] ss:$8 sps:$4 sm:$0xff]  }
  0xd9   :  { %2852 = vmatpush1.bf16.msra.mxu0 %v4182_v51  ;;  %2648 = vmatprep.subr.bf16.mxu1 %v4187_v52  ;;  %v4259_v51 = vld [vmem:[#allocation5 + $0x234] ss:$8 sps:$4 sm:$0xff]  }
  0xda   :  { %2853 = vmatprep.subr.bf16.mxu0 %v4190_v54  ;;  %v4262_v52 = vld [vmem:[#allocation5 + $0x734] ss:$8 sps:$4 sm:$0xff]   ;;  %v4260_v54 = vld [vmem:[#allocation5 + $0x730] ss:$8 sps:$4 sm:$0xff]  }
  0xdc   :  { %2649 = vmatpush1.bf16.msra.mxu1 %v4185_v56  ;;  %v4268_v56 = vld [vmem:[#allocation5 + $0x744] ss:$8 sps:$4 sm:$0xff]  }
  0xdd   :  { %2854 = vmatpush1.bf16.msra.mxu0 %v4188_v57  ;;  %2650 = vmatprep.subr.bf16.mxu1 %v4193_v58  ;;  %v4263_v57 = vld [vmem:[#allocation5 + $0x240] ss:$8 sps:$4 sm:$0xff]  }
  0xde   :  { %2855 = vmatprep.subr.bf16.mxu0 %v4196_v60  ;;  %v4266_v58 = vld [vmem:[#allocation5 + $0x740] ss:$8 sps:$4 sm:$0xff]   ;;  %v4274_v60 = vld [vmem:[#allocation5 + $0x754] ss:$8 sps:$4 sm:$0xff]  }
  0xe0   :  { %2651 = vmatpush1.bf16.msra.mxu1 %v4191_v61  ;;  %v4269_v61 = vld [vmem:[#allocation5 + $0x250] ss:$8 sps:$4 sm:$0xff]  }
  0xe1   :  { %2856 = vmatpush1.bf16.msra.mxu0 %v4194_v62  ;;  %2652 = vmatprep.subr.bf16.mxu1 %v4199_v63  ;;  %v4272_v62 = vld [vmem:[#allocation5 + $0x750] ss:$8 sps:$4 sm:$0xff]   ;;  %v4277_v63 = vld [vmem:[#allocation5 + $0x264] ss:$8 sps:$4 sm:$0xff]  }
  0xe2   :  { %2857 = vmatprep.subr.bf16.mxu0 %v4202_v0  ;;  %v4280_v0 = vld [vmem:[#allocation5 + $0x764] ss:$8 sps:$4 sm:$0xff]  }
  0xe4   :  { %2653 = vmatpush1.bf16.msra.mxu1 %v4197_v1  ;;  %v4275_v1 = vld [vmem:[#allocation5 + $0x260] ss:$8 sps:$4 sm:$0xff]  }
  0xe5   :  { %2858 = vmatpush1.bf16.msra.mxu0 %v4200_v2  ;;  %2654 = vmatprep.subr.bf16.mxu1 %v4205_v3  ;;  %v4278_v2 = vld [vmem:[#allocation5 + $0x760] ss:$8 sps:$4 sm:$0xff]   ;;  %v4283_v3 = vld [vmem:[#allocation5 + $0x274] ss:$8 sps:$4 sm:$0xff]  }
  0xe6   :  { %2859 = vmatprep.subr.bf16.mxu0 %v4208_v4  ;;  %v4286_v4 = vld [vmem:[#allocation5 + $0x774] ss:$8 sps:$4 sm:$0xff]  }
  0xe8   :  { %2655 = vmatpush1.bf16.msra.mxu1 %v4203_v5  ;;  %v4281_v5 = vld [vmem:[#allocation5 + $0x270] ss:$8 sps:$4 sm:$0xff]  }
  0xe9   :  { %2860 = vmatpush1.bf16.msra.mxu0 %v4206_v6  ;;  %2656 = vmatprep.subr.bf16.mxu1 %v4211_v7  ;;  %v4284_v6 = vld [vmem:[#allocation5 + $0x770] ss:$8 sps:$4 sm:$0xff]   ;;  %v4289_v7 = vld [vmem:[#allocation5 + $0x284] ss:$8 sps:$4 sm:$0xff]  }
  0xea   :  { %2861 = vmatprep.subr.bf16.mxu0 %v4214_v8  ;;  %v4292_v8 = vld [vmem:[#allocation5 + $0x784] ss:$8 sps:$4 sm:$0xff]  }
  0xec   :  { %2657 = vmatpush1.bf16.msra.mxu1 %v4209_v9  ;;  %v4287_v9 = vld [vmem:[#allocation5 + $0x280] ss:$8 sps:$4 sm:$0xff]  }
  0xed   :  { %2862 = vmatpush1.bf16.msra.mxu0 %v4212_v10  ;;  %2658 = vmatprep.subr.bf16.mxu1 %v4217_v11  ;;  %v4290_v10 = vld [vmem:[#allocation5 + $0x780] ss:$8 sps:$4 sm:$0xff]   ;;  %v4295_v11 = vld [vmem:[#allocation5 + $0x294] ss:$8 sps:$4 sm:$0xff]  }
  0xee   :  { %2863 = vmatprep.subr.bf16.mxu0 %v4220_v12  ;;  %v4298_v12 = vld [vmem:[#allocation5 + $0x794] ss:$8 sps:$4 sm:$0xff]  }
  0xf0   :  { %2659 = vmatpush1.bf16.msra.mxu1 %v4215_v13  ;;  %v4293_v13 = vld [vmem:[#allocation5 + $0x290] ss:$8 sps:$4 sm:$0xff]  }
  0xf1   :  { %2864 = vmatpush1.bf16.msra.mxu0 %v4218_v15  ;;  %2660 = vmatprep.subr.bf16.mxu1 %v4223_v16  ;;  %v4296_v15 = vld [vmem:[#allocation5 + $0x790] ss:$8 sps:$4 sm:$0xff]   ;;  %v4301_v16 = vld [vmem:[#allocation5 + $0x2a4] ss:$8 sps:$4 sm:$0xff]  }
  0xf2   :  { %2865 = vmatprep.subr.bf16.mxu0 %v4226_v17  ;;  %v4304_v17 = vld [vmem:[#allocation5 + $0x7a4] ss:$8 sps:$4 sm:$0xff]  }
  0xf4   :  { %2661 = vmatpush1.bf16.msra.mxu1 %v4221_v18  ;;  %v4299_v18 = vld [vmem:[#allocation5 + $0x2a0] ss:$8 sps:$4 sm:$0xff]  }
  0xf5   :  { %2866 = vmatpush1.bf16.msra.mxu0 %v4224_v19  ;;  %2662 = vmatprep.subr.bf16.mxu1 %v4229_v20  ;;  %v4302_v19 = vld [vmem:[#allocation5 + $0x7a0] ss:$8 sps:$4 sm:$0xff]   ;;  %v4307_v20 = vld [vmem:[#allocation5 + $0x2b4] ss:$8 sps:$4 sm:$0xff]  }
  0xf6   :  { %2867 = vmatprep.subr.bf16.mxu0 %v4232_v21  ;;  %v4310_v21 = vld [vmem:[#allocation5 + $0x7b4] ss:$8 sps:$4 sm:$0xff]  }
  0xf8   :  { %2663 = vmatpush1.bf16.msra.mxu1 %v4227_v23  ;;  %v4308_v23 = vld [vmem:[#allocation5 + $0x7b0] ss:$8 sps:$4 sm:$0xff]  }
  0xf9   :  { %2868 = vmatpush1.bf16.msra.mxu0 %v4230_v24  ;;  %2664 = vmatprep.subr.bf16.mxu1 %v4235_v25  ;;  %v4313_v24 = vld [vmem:[#allocation5 + $0x2c4] ss:$8 sps:$4 sm:$0xff]  }
  0xfa   :  { %2869 = vmatprep.subr.bf16.mxu0 %v4238_v26  ;;  %v4316_v25 = vld [vmem:[#allocation5 + $0x7c4] ss:$8 sps:$4 sm:$0xff]   ;;  %v4311_v26 = vld [vmem:[#allocation5 + $0x2c0] ss:$8 sps:$4 sm:$0xff]  }
  0xfc   :  { %2665 = vmatpush1.bf16.msra.mxu1 %v4233_v28  ;;  %v4314_v28 = vld [vmem:[#allocation5 + $0x7c0] ss:$8 sps:$4 sm:$0xff]  }
  0xfd   :  { %2870 = vmatpush1.bf16.msra.mxu0 %v4236_v29  ;;  %2675 = vmatprep.subr.bf16.mxu1 %v4241_v30  ;;  %v4319_v29 = vld [vmem:[#allocation5 + $0x2d4] ss:$8 sps:$4 sm:$0xff]  }
  0xfe   :  { %2880 = vmatprep.subr.bf16.mxu0 %v4244_v31  ;;  %v4322_v30 = vld [vmem:[#allocation5 + $0x7d4] ss:$8 sps:$4 sm:$0xff]   ;;  %v4317_v31 = vld [vmem:[#allocation5 + $0x2d0] ss:$8 sps:$4 sm:$0xff]  }
  0xff   :  { %2667 = vmatmul.mubr.bf16.vlgmr.msra.gmra.mrb[0].mxu1 %v255_v35  ;;  %v4323_v35 = vld [vmem:[#allocation5 + $0x2e0] ss:$8 sps:$4 sm:$0xff]  }
 0x100   :  { %2872 = vmatmul.mubr.bf16.vlgmr.msra.gmra.mrb[0].mxu0 %v265_v36  ;;  %2676 = vmatpush1.bf16.msra.mxu1 %v4239_v33  ;;  %v4325_v33 = vld [vmem:[#allocation5 + $0x2e4] ss:$8 sps:$4 sm:$0xff]   ;;  %v144_v36 = vcombine.high %v5053_v39, %v5053_v39  ;;  %v4332_v39 = vld [vmem:[#allocation5 + $0x7f0] ss:$8 sps:$4 sm:$0xff]  }
 0x101   :  { %2881 = vmatpush1.bf16.msra.mxu0 %v4242_v34  ;;  %2677 = vmatprep.subr.bf16.mxu1 %v4247_v37  ;;  %v4328_v34 = vld [vmem:[#allocation5 + $0x7e4] ss:$8 sps:$4 sm:$0xff]   ;;  %v5063_v37 = vld [vmem:[#allocation2 + $0x20] sm:$0xff] }
 0x102   :  { %2882 = vmatprep.subr.bf16.mxu0 %v4250_v38  ;;  %2912 = vmatprep.mubr.bf16.mxu0 %v268_v41  ;;  %v4326_v38 = vld [vmem:[#allocation5 + $0x7e0] ss:$8 sps:$4 sm:$0xff]   ;;  %v4331_v41 = vld [vmem:[#allocation5 + $0x2f4] ss:$8 sps:$4 sm:$0xff]  }
 0x103   :  { %2707 = vmatprep.mubr.bf16.mxu1 %v258_v47  ;;  %v4341_v47 = vld [vmem:[#allocation5 + $0x804] ss:$8 sps:$4 sm:$0xff]  }
 0x104   :  { %2678 = vmatpush1.bf16.msra.mxu1 %v4245_v42  ;;  %v4334_v42 = vld [vmem:[#allocation5 + $0x7f4] ss:$8 sps:$4 sm:$0xff]  }
 0x105   :  { %2883 = vmatpush1.bf16.msra.mxu0 %v4248_v14  ;;  %2679 = vmatprep.subr.bf16.mxu1 %v4253_v44  ;;  %v5066_v14 = vrot.slane %v144_v36, %v5019_v49  ;;  %v5070_v44 = vrot.slane %v5063_v37, %v5019_v49  ;;  %v4405_v36 = vld [vmem:[#allocation5 + $0x8b0] ss:$8 sps:$4 sm:$0xff]  }
 0x106   :  { %2884 = vmatprep.subr.bf16.mxu0 %v4256_v46  ;;  %v4337_v46 = vld [vmem:[#allocation5 + $0x304] ss:$8 sps:$4 sm:$0xff]  }
 0x108   :  { %2680 = vmatpush1.bf16.msra.mxu1 %v4251_v48  ;;  %v160_v48 = vcombine.high %v5066_v14, %v5066_v14 }
 0x109   :  { %2885 = vmatpush1.bf16.msra.mxu0 %v4254_v50  ;;  %2681 = vmatprep.subr.bf16.mxu1 %v4259_v51  ;;  %v210_v50 = vcombine.high %v5070_v44, %v5070_v44  ;;  %v4335_v51 = vld [vmem:[#allocation5 + $0x300] ss:$8 sps:$4 sm:$0xff]  }
 0x10a   :  { %2886 = vmatprep.subr.bf16.mxu0 %v4262_v52  ;;  %v257_v52 = vpack.c.bf16 %v5057_v40, %v5057_v40  ;;  %v4350_v40 = vld [vmem:[#allocation5 + $0x324] ss:$8 sps:$4 sm:$0xff]  }
 0x10c   :  { %2682 = vmatpush1.bf16.msra.mxu1 %v4257_v53  ;;  %v267_v53 = vpack.c.bf16 %v5045_v27, %v5045_v27  ;;  %v4348_v27 = vld [vmem:[#allocation5 + $0x320] ss:$8 sps:$4 sm:$0xff]  }
 0x10d   :  { %2887 = vmatpush1.bf16.msra.mxu0 %v4260_v54  ;;  %2683 = vmatprep.subr.bf16.mxu1 %v4265_v55  ;;  %v4339_v54 = vld [vmem:[#allocation5 + $0x800] ss:$8 sps:$4 sm:$0xff]   ;;  %v4344_v55 = vld [vmem:[#allocation5 + $0x314] ss:$8 sps:$4 sm:$0xff]  }
 0x10e   :  { %2888 = vmatprep.subr.bf16.mxu0 %v4268_v56  ;;  %v4347_v56 = vld [vmem:[#allocation5 + $0x814] ss:$8 sps:$4 sm:$0xff]  }
 0x110   :  { %2684 = vmatpush1.bf16.msra.mxu1 %v4263_v57  ;;  %v260_v57 = vpack.c.bf16 %v160_v48, %v160_v48  ;;  %v4417_v48 = vld [vmem:[#allocation5 + $0x8d0] ss:$8 sps:$4 sm:$0xff]  }
 0x111   :  { %2889 = vmatpush1.bf16.msra.mxu0 %v4266_v58  ;;  %2685 = vmatprep.subr.bf16.mxu1 %v4271_v59  ;;  %v270_v58 = vpack.c.bf16 %v210_v50, %v210_v50  ;;  %v4342_v59 = vld [vmem:[#allocation5 + $0x310] ss:$8 sps:$4 sm:$0xff]   ;;  %v4422_v50 = vld [vmem:[#allocation5 + $0x3e4] ss:$8 sps:$4 sm:$0xff]  }
 0x112   :  { %2890 = vmatprep.subr.bf16.mxu0 %v4274_v60  ;;  %v4345_v60 = vld [vmem:[#allocation5 + $0x810] ss:$8 sps:$4 sm:$0xff]  }
 0x114   :  { %2686 = vmatpush1.bf16.msra.mxu1 %v4269_v61  ;;  %v4353_v61 = vld [vmem:[#allocation5 + $0x824] ss:$8 sps:$4 sm:$0xff]  }
 0x115   :  { %2891 = vmatpush1.bf16.msra.mxu0 %v4272_v62  ;;  %2687 = vmatprep.subr.bf16.mxu1 %v4277_v63  ;;  %v4351_v62 = vld [vmem:[#allocation5 + $0x820] ss:$8 sps:$4 sm:$0xff]   ;;  %v4356_v63 = vld [vmem:[#allocation5 + $0x334] ss:$8 sps:$4 sm:$0xff]  }
 0x116   :  { %2892 = vmatprep.subr.bf16.mxu0 %v4280_v0  ;;  %v4359_v0 = vld [vmem:[#allocation5 + $0x834] ss:$8 sps:$4 sm:$0xff]  }
 0x118   :  { %2688 = vmatpush1.bf16.msra.mxu1 %v4275_v1  ;;  %v4354_v1 = vld [vmem:[#allocation5 + $0x330] ss:$8 sps:$4 sm:$0xff]  }
 0x119   :  { %2893 = vmatpush1.bf16.msra.mxu0 %v4278_v2  ;;  %2689 = vmatprep.subr.bf16.mxu1 %v4283_v3  ;;  %v4357_v2 = vld [vmem:[#allocation5 + $0x830] ss:$8 sps:$4 sm:$0xff]   ;;  %v4362_v3 = vld [vmem:[#allocation5 + $0x344] ss:$8 sps:$4 sm:$0xff]  }
 0x11a   :  { %2894 = vmatprep.subr.bf16.mxu0 %v4286_v4  ;;  %v4365_v4 = vld [vmem:[#allocation5 + $0x844] ss:$8 sps:$4 sm:$0xff]  }
 0x11c   :  { %2690 = vmatpush1.bf16.msra.mxu1 %v4281_v5  ;;  %v4360_v5 = vld [vmem:[#allocation5 + $0x340] ss:$8 sps:$4 sm:$0xff]  }
 0x11d   :  { %2895 = vmatpush1.bf16.msra.mxu0 %v4284_v6  ;;  %2691 = vmatprep.subr.bf16.mxu1 %v4289_v7  ;;  %v4363_v6 = vld [vmem:[#allocation5 + $0x840] ss:$8 sps:$4 sm:$0xff]   ;;  %v4368_v7 = vld [vmem:[#allocation5 + $0x354] ss:$8 sps:$4 sm:$0xff]  }
 0x11e   :  { %2896 = vmatprep.subr.bf16.mxu0 %v4292_v8  ;;  %v4371_v8 = vld [vmem:[#allocation5 + $0x854] ss:$8 sps:$4 sm:$0xff]  }
 0x120   :  { %2692 = vmatpush1.bf16.msra.mxu1 %v4287_v9  ;;  %v4366_v9 = vld [vmem:[#allocation5 + $0x350] ss:$8 sps:$4 sm:$0xff]  }
 0x121   :  { %2897 = vmatpush1.bf16.msra.mxu0 %v4290_v10  ;;  %2693 = vmatprep.subr.bf16.mxu1 %v4295_v11  ;;  %v4369_v10 = vld [vmem:[#allocation5 + $0x850] ss:$8 sps:$4 sm:$0xff]   ;;  %v4374_v11 = vld [vmem:[#allocation5 + $0x364] ss:$8 sps:$4 sm:$0xff]  }
 0x122   :  { %2898 = vmatprep.subr.bf16.mxu0 %v4298_v12  ;;  %v4377_v12 = vld [vmem:[#allocation5 + $0x864] ss:$8 sps:$4 sm:$0xff]  }
 0x124   :  { %2694 = vmatpush1.bf16.msra.mxu1 %v4293_v13  ;;  %v4372_v13 = vld [vmem:[#allocation5 + $0x360] ss:$8 sps:$4 sm:$0xff]  }
 0x125   :  { %2899 = vmatpush1.bf16.msra.mxu0 %v4296_v15  ;;  %2695 = vmatprep.subr.bf16.mxu1 %v4301_v16  ;;  %v4375_v15 = vld [vmem:[#allocation5 + $0x860] ss:$8 sps:$4 sm:$0xff]   ;;  %v4380_v16 = vld [vmem:[#allocation5 + $0x374] ss:$8 sps:$4 sm:$0xff]  }
 0x126   :  { %2900 = vmatprep.subr.bf16.mxu0 %v4304_v17  ;;  %v4383_v17 = vld [vmem:[#allocation5 + $0x874] ss:$8 sps:$4 sm:$0xff]  }
 0x128   :  { %2696 = vmatpush1.bf16.msra.mxu1 %v4299_v18  ;;  %v4378_v18 = vld [vmem:[#allocation5 + $0x370] ss:$8 sps:$4 sm:$0xff]  }
 0x129   :  { %2901 = vmatpush1.bf16.msra.mxu0 %v4302_v19  ;;  %2697 = vmatprep.subr.bf16.mxu1 %v4307_v20  ;;  %v4381_v19 = vld [vmem:[#allocation5 + $0x870] ss:$8 sps:$4 sm:$0xff]   ;;  %v4386_v20 = vld [vmem:[#allocation5 + $0x384] ss:$8 sps:$4 sm:$0xff]  }
 0x12a   :  { %2902 = vmatprep.subr.bf16.mxu0 %v4310_v21  ;;  %v4389_v21 = vld [vmem:[#allocation5 + $0x884] ss:$8 sps:$4 sm:$0xff]  }
 0x12c   :  { %2698 = vmatpush1.bf16.msra.mxu1 %v4305_v22  ;;  %v4384_v22 = vld [vmem:[#allocation5 + $0x380] ss:$8 sps:$4 sm:$0xff]  }
 0x12d   :  { %2903 = vmatpush1.bf16.msra.mxu0 %v4308_v23  ;;  %2699 = vmatprep.subr.bf16.mxu1 %v4313_v24  ;;  %v4387_v23 = vld [vmem:[#allocation5 + $0x880] ss:$8 sps:$4 sm:$0xff]   ;;  %v4392_v24 = vld [vmem:[#allocation5 + $0x394] ss:$8 sps:$4 sm:$0xff]  }
 0x12e   :  { %2904 = vmatprep.subr.bf16.mxu0 %v4316_v25  ;;  %v4395_v25 = vld [vmem:[#allocation5 + $0x894] ss:$8 sps:$4 sm:$0xff]  }
 0x130   :  { %2700 = vmatpush1.bf16.msra.mxu1 %v4311_v26  ;;  %v4390_v26 = vld [vmem:[#allocation5 + $0x390] ss:$8 sps:$4 sm:$0xff]  }
 0x131   :  { %2905 = vmatpush1.bf16.msra.mxu0 %v4314_v28  ;;  %2701 = vmatprep.subr.bf16.mxu1 %v4319_v29  ;;  %v4393_v28 = vld [vmem:[#allocation5 + $0x890] ss:$8 sps:$4 sm:$0xff]   ;;  %v4398_v29 = vld [vmem:[#allocation5 + $0x3a4] ss:$8 sps:$4 sm:$0xff]  }
 0x132   :  { %2906 = vmatprep.subr.bf16.mxu0 %v4322_v30  ;;  %v4401_v30 = vld [vmem:[#allocation5 + $0x8a4] ss:$8 sps:$4 sm:$0xff]  }
 0x134   :  { %2702 = vmatpush1.bf16.msra.mxu1 %v4317_v31  ;;  %v4396_v31 = vld [vmem:[#allocation5 + $0x3a0] ss:$8 sps:$4 sm:$0xff]  }
 0x135   :  { %2907 = vmatpush1.bf16.msra.mxu0 %v4320_v32  ;;  %2703 = vmatprep.subr.bf16.mxu1 %v4325_v33  ;;  %v4399_v32 = vld [vmem:[#allocation5 + $0x8a0] ss:$8 sps:$4 sm:$0xff]   ;;  %v4404_v33 = vld [vmem:[#allocation5 + $0x3b4] ss:$8 sps:$4 sm:$0xff]  }
 0x136   :  { %2908 = vmatprep.subr.bf16.mxu0 %v4328_v34  ;;  %v4407_v34 = vld [vmem:[#allocation5 + $0x8b4] ss:$8 sps:$4 sm:$0xff]  }
 0x138   :  { %2704 = vmatpush1.bf16.msra.mxu1 %v4323_v35  ;;  %v4402_v35 = vld [vmem:[#allocation5 + $0x3b0] ss:$8 sps:$4 sm:$0xff]  }
 0x139   :  { %2909 = vmatpush1.bf16.msra.mxu0 %v4326_v38  ;;  %2705 = vmatprep.subr.bf16.mxu1 %v4331_v41  ;;  %v4410_v38 = vld [vmem:[#allocation5 + $0x3c4] ss:$8 sps:$4 sm:$0xff]  }
 0x13a   :  { %2910 = vmatprep.subr.bf16.mxu0 %v4334_v42  ;;  %v4413_v41 = vld [vmem:[#allocation5 + $0x8c4] ss:$8 sps:$4 sm:$0xff]   ;;  %v4408_v42 = vld [vmem:[#allocation5 + $0x3c0] ss:$8 sps:$4 sm:$0xff]  }
 0x13c   :  { %2706 = vmatpush1.bf16.msra.mxu1 %v4329_v45  ;;  %v4411_v45 = vld [vmem:[#allocation5 + $0x8c0] ss:$8 sps:$4 sm:$0xff]  }
 0x13d   :  { %2911 = vmatpush1.bf16.msra.mxu0 %v4332_v39  ;;  %2716 = vmatprep.subr.bf16.mxu1 %v4337_v46  ;;  %v4416_v39 = vld [vmem:[#allocation5 + $0x3d4] ss:$8 sps:$4 sm:$0xff]  }
 0x13e   :  { %2921 = vmatprep.subr.bf16.mxu0 %v4341_v47  ;;  %v4419_v46 = vld [vmem:[#allocation5 + $0x8d4] ss:$8 sps:$4 sm:$0xff]   ;;  %v4414_v47 = vld [vmem:[#allocation5 + $0x3d0] ss:$8 sps:$4 sm:$0xff]  }
 0x13f   :  { %2708 = vmatmul.mubr.bf16.vlgmr.msra.gmra.mrb[0].mxu1 %v257_v52  ;;  %v4420_v52 = vld [vmem:[#allocation5 + $0x3e0] ss:$8 sps:$4 sm:$0xff]  }
 0x140   :  { %2913 = vmatmul.mubr.bf16.vlgmr.msra.gmra.mrb[0].mxu0 %v267_v53  ;;  %2717 = vmatpush1.bf16.msra.mxu1 %v4335_v51  ;;  %v4425_v51 = vld [vmem:[#allocation5 + $0x8e4] ss:$8 sps:$4 sm:$0xff]   ;;  %v4423_v53 = vld [vmem:[#allocation5 + $0x8e0] ss:$8 sps:$4 sm:$0xff]  }
 0x141   :  { %2922 = vmatpush1.bf16.msra.mxu0 %v4339_v54  ;;  %2718 = vmatprep.subr.bf16.mxu1 %v4344_v55  ;;  %v195_v54 = vcombine.high %v5063_v37, %v5063_v37  ;;  %v4428_v55 = vld [vmem:[#allocation5 + $0x3f4] ss:$8 sps:$4 sm:$0xff]   ;;  %v4433_v37 = vld [vmem:[#allocation5 + $0x400] ss:$8 sps:$4 sm:$0xff]  }
 0x142   :  { %2923 = vmatprep.subr.bf16.mxu0 %v4347_v56  ;;  %2748 = vmatprep.mubr.bf16.mxu1 %v260_v57  ;;  %v4431_v56 = vld [vmem:[#allocation5 + $0x8f4] ss:$8 sps:$4 sm:$0xff]   ;;  %v4426_v57 = vld [vmem:[#allocation5 + $0x3f0] ss:$8 sps:$4 sm:$0xff]  }
 0x143   :  { %2953 = vmatprep.mubr.bf16.mxu0 %v270_v58  ;;  %v5082_v58 = vld.sshfl [vmem:[#allocation2 + $0x10] sm:$0xff pattern:$0x76325410] }
 0x144   :  { %2719 = vmatpush1.bf16.msra.mxu1 %v4342_v59  ;;  %v5085_v59 = vrot.slane %v195_v54, %v5019_v49  ;;  %v4510_v54 = vld [vmem:[#allocation5 + $0x9c4] ss:$8 sps:$4 sm:$0xff]  }
 0x145   :  { %2924 = vmatpush1.bf16.msra.mxu0 %v4345_v60  ;;  %2720 = vmatprep.subr.bf16.mxu1 %v4350_v40  ;;  %v4429_v60 = vld [vmem:[#allocation5 + $0x8f0] ss:$8 sps:$4 sm:$0xff]   ;;  %v4435_v40 = vld [vmem:[#allocation5 + $0x404] ss:$8 sps:$4 sm:$0xff]  }
 0x146   :  { %2925 = vmatprep.subr.bf16.mxu0 %v4353_v61  ;;  %v4438_v61 = vld [vmem:[#allocation5 + $0x904] ss:$8 sps:$4 sm:$0xff]  }
 0x148   :  { %2721 = vmatpush1.bf16.msra.mxu1 %v4348_v27  ;;  %v4436_v27 = vld [vmem:[#allocation5 + $0x900] ss:$8 sps:$4 sm:$0xff]  }
 0x149   :  { %2926 = vmatpush1.bf16.msra.mxu0 %v4351_v62  ;;  %2722 = vmatprep.subr.bf16.mxu1 %v4356_v63  ;;  %v176_v62 = vcombine.high %v5082_v58, %v5082_v58  ;;  %v211_v63 = vcombine.high %v5085_v59, %v5085_v59 }
 0x14a   :  { %2927 = vmatprep.subr.bf16.mxu0 %v4359_v0  ;;  %v259_v0 = vpack.c.bf16 %v5066_v14, %v5066_v14  ;;  %v4445_v14 = vld [vmem:[#allocation5 + $0x420] ss:$8 sps:$4 sm:$0xff]  }
 0x14c   :  { %2723 = vmatpush1.bf16.msra.mxu1 %v4354_v1  ;;  %v269_v1 = vpack.c.bf16 %v5070_v44, %v5070_v44  ;;  %v4448_v44 = vld [vmem:[#allocation5 + $0x920] ss:$8 sps:$4 sm:$0xff]  }
 0x14d   :  { %2928 = vmatpush1.bf16.msra.mxu0 %v4357_v2  ;;  %2724 = vmatprep.subr.bf16.mxu1 %v4362_v3  ;;  %v4441_v2 = vld [vmem:[#allocation5 + $0x414] ss:$8 sps:$4 sm:$0xff]  }
 0x14e   :  { %2929 = vmatprep.subr.bf16.mxu0 %v4365_v4  ;;  %v4444_v3 = vld [vmem:[#allocation5 + $0x914] ss:$8 sps:$4 sm:$0xff]   ;;  %v4439_v4 = vld [vmem:[#allocation5 + $0x410] ss:$8 sps:$4 sm:$0xff]  }
 0x150   :  { %2725 = vmatpush1.bf16.msra.mxu1 %v4360_v5  ;;  %v4442_v5 = vld [vmem:[#allocation5 + $0x910] ss:$8 sps:$4 sm:$0xff]  }
 0x151   :  { %2930 = vmatpush1.bf16.msra.mxu0 %v4363_v6  ;;  %2726 = vmatprep.subr.bf16.mxu1 %v4368_v7  ;;  %v262_v6 = vpack.c.bf16 %v176_v62, %v176_v62  ;;  %v272_v7 = vpack.c.bf16 %v211_v63, %v211_v63  ;;  %v5095_v62 = vld [vmem:[#allocation2 + $0x28] sm:$0xff]  ;;  %v4517_v63 = vld [vmem:[#allocation5 + $0x4e0] ss:$8 sps:$4 sm:$0xff]  }
 0x152   :  { %2931 = vmatprep.subr.bf16.mxu0 %v4371_v8  ;;  %v4447_v8 = vld [vmem:[#allocation5 + $0x424] ss:$8 sps:$4 sm:$0xff]  }
 0x154   :  { %2727 = vmatpush1.bf16.msra.mxu1 %v4366_v9  ;;  %v4450_v9 = vld [vmem:[#allocation5 + $0x924] ss:$8 sps:$4 sm:$0xff]  }
 0x155   :  { %2932 = vmatpush1.bf16.msra.mxu0 %v4369_v10  ;;  %2728 = vmatprep.subr.bf16.mxu1 %v4374_v11  ;;  %v4453_v10 = vld [vmem:[#allocation5 + $0x434] ss:$8 sps:$4 sm:$0xff]  }
 0x156   :  { %2933 = vmatprep.subr.bf16.mxu0 %v4377_v12  ;;  %v4456_v11 = vld [vmem:[#allocation5 + $0x934] ss:$8 sps:$4 sm:$0xff]   ;;  %v4451_v12 = vld [vmem:[#allocation5 + $0x430] ss:$8 sps:$4 sm:$0xff]  }
 0x158   :  { %2729 = vmatpush1.bf16.msra.mxu1 %v4372_v13  ;;  %v4454_v13 = vld [vmem:[#allocation5 + $0x930] ss:$8 sps:$4 sm:$0xff]  }
 0x159   :  { %2934 = vmatpush1.bf16.msra.mxu0 %v4375_v15  ;;  %2730 = vmatprep.subr.bf16.mxu1 %v4380_v16  ;;  %v4459_v15 = vld [vmem:[#allocation5 + $0x444] ss:$8 sps:$4 sm:$0xff]  }
 0x15a   :  { %2935 = vmatprep.subr.bf16.mxu0 %v4383_v17  ;;  %v4462_v16 = vld [vmem:[#allocation5 + $0x944] ss:$8 sps:$4 sm:$0xff]   ;;  %v4457_v17 = vld [vmem:[#allocation5 + $0x440] ss:$8 sps:$4 sm:$0xff]  }
 0x15c   :  { %2731 = vmatpush1.bf16.msra.mxu1 %v4378_v18  ;;  %v4460_v18 = vld [vmem:[#allocation5 + $0x940] ss:$8 sps:$4 sm:$0xff]  }
 0x15d   :  { %2936 = vmatpush1.bf16.msra.mxu0 %v4381_v19  ;;  %2732 = vmatprep.subr.bf16.mxu1 %v4386_v20  ;;  %v4465_v19 = vld [vmem:[#allocation5 + $0x454] ss:$8 sps:$4 sm:$0xff]  }
 0x15e   :  { %2937 = vmatprep.subr.bf16.mxu0 %v4389_v21  ;;  %v4468_v20 = vld [vmem:[#allocation5 + $0x954] ss:$8 sps:$4 sm:$0xff]   ;;  %v4463_v21 = vld [vmem:[#allocation5 + $0x450] ss:$8 sps:$4 sm:$0xff]  }
 0x160   :  { %2733 = vmatpush1.bf16.msra.mxu1 %v4384_v22  ;;  %v4466_v22 = vld [vmem:[#allocation5 + $0x950] ss:$8 sps:$4 sm:$0xff]  }
 0x161   :  { %2938 = vmatpush1.bf16.msra.mxu0 %v4387_v23  ;;  %2734 = vmatprep.subr.bf16.mxu1 %v4392_v24  ;;  %v4471_v23 = vld [vmem:[#allocation5 + $0x464] ss:$8 sps:$4 sm:$0xff]  }
 0x162   :  { %2939 = vmatprep.subr.bf16.mxu0 %v4395_v25  ;;  %v4474_v24 = vld [vmem:[#allocation5 + $0x964] ss:$8 sps:$4 sm:$0xff]   ;;  %v4469_v25 = vld [vmem:[#allocation5 + $0x460] ss:$8 sps:$4 sm:$0xff]  }
 0x164   :  { %2735 = vmatpush1.bf16.msra.mxu1 %v4390_v26  ;;  %v4472_v26 = vld [vmem:[#allocation5 + $0x960] ss:$8 sps:$4 sm:$0xff]  }
 0x165   :  { %2940 = vmatpush1.bf16.msra.mxu0 %v4393_v28  ;;  %2736 = vmatprep.subr.bf16.mxu1 %v4398_v29  ;;  %v4477_v28 = vld [vmem:[#allocation5 + $0x474] ss:$8 sps:$4 sm:$0xff]  }
 0x166   :  { %2941 = vmatprep.subr.bf16.mxu0 %v4401_v30  ;;  %v4480_v29 = vld [vmem:[#allocation5 + $0x974] ss:$8 sps:$4 sm:$0xff]   ;;  %v4475_v30 = vld [vmem:[#allocation5 + $0x470] ss:$8 sps:$4 sm:$0xff]  }
 0x168   :  { %2737 = vmatpush1.bf16.msra.mxu1 %v4396_v31  ;;  %v4478_v31 = vld [vmem:[#allocation5 + $0x970] ss:$8 sps:$4 sm:$0xff]  }
 0x169   :  { %2942 = vmatpush1.bf16.msra.mxu0 %v4399_v32  ;;  %2738 = vmatprep.subr.bf16.mxu1 %v4404_v33  ;;  %v4483_v32 = vld [vmem:[#allocation5 + $0x484] ss:$8 sps:$4 sm:$0xff]  }
 0x16a   :  { %2943 = vmatprep.subr.bf16.mxu0 %v4407_v34  ;;  %v4486_v33 = vld [vmem:[#allocation5 + $0x984] ss:$8 sps:$4 sm:$0xff]   ;;  %v4481_v34 = vld [vmem:[#allocation5 + $0x480] ss:$8 sps:$4 sm:$0xff]  }
 0x16c   :  { %2739 = vmatpush1.bf16.msra.mxu1 %v4402_v35  ;;  %v4484_v35 = vld [vmem:[#allocation5 + $0x980] ss:$8 sps:$4 sm:$0xff]  }
 0x16d   :  { %2944 = vmatpush1.bf16.msra.mxu0 %v4405_v36  ;;  %2740 = vmatprep.subr.bf16.mxu1 %v4410_v38  ;;  %v4489_v36 = vld [vmem:[#allocation5 + $0x494] ss:$8 sps:$4 sm:$0xff]  }
 0x16e   :  { %2945 = vmatprep.subr.bf16.mxu0 %v4413_v41  ;;  %v4492_v38 = vld [vmem:[#allocation5 + $0x994] ss:$8 sps:$4 sm:$0xff]   ;;  %v4487_v41 = vld [vmem:[#allocation5 + $0x490] ss:$8 sps:$4 sm:$0xff]  }
 0x170   :  { %2741 = vmatpush1.bf16.msra.mxu1 %v4408_v42  ;;  %v4490_v42 = vld [vmem:[#allocation5 + $0x990] ss:$8 sps:$4 sm:$0xff]  }
 0x171   :  { %2946 = vmatpush1.bf16.msra.mxu0 %v4411_v45  ;;  %2742 = vmatprep.subr.bf16.mxu1 %v4416_v39  ;;  %v4495_v45 = vld [vmem:[#allocation5 + $0x4a4] ss:$8 sps:$4 sm:$0xff]  }
 0x172   :  { %2947 = vmatprep.subr.bf16.mxu0 %v4419_v46  ;;  %v4498_v39 = vld [vmem:[#allocation5 + $0x9a4] ss:$8 sps:$4 sm:$0xff]   ;;  %v4493_v46 = vld [vmem:[#allocation5 + $0x4a0] ss:$8 sps:$4 sm:$0xff]  }
 0x174   :  { %2743 = vmatpush1.bf16.msra.mxu1 %v4414_v47  ;;  %v4496_v47 = vld [vmem:[#allocation5 + $0x9a0] ss:$8 sps:$4 sm:$0xff]  }
 0x175   :  { %2948 = vmatpush1.bf16.msra.mxu0 %v4417_v48  ;;  %2744 = vmatprep.subr.bf16.mxu1 %v4422_v50  ;;  %v4501_v48 = vld [vmem:[#allocation5 + $0x4b4] ss:$8 sps:$4 sm:$0xff]  }
 0x176   :  { %2949 = vmatprep.subr.bf16.mxu0 %v4425_v51  ;;  %v4504_v50 = vld [vmem:[#allocation5 + $0x9b4] ss:$8 sps:$4 sm:$0xff]   ;;  %v4499_v51 = vld [vmem:[#allocation5 + $0x4b0] ss:$8 sps:$4 sm:$0xff]  }
 0x178   :  { %2745 = vmatpush1.bf16.msra.mxu1 %v4420_v52  ;;  %v4502_v52 = vld [vmem:[#allocation5 + $0x9b0] ss:$8 sps:$4 sm:$0xff]  }
 0x179   :  { %2950 = vmatpush1.bf16.msra.mxu0 %v4423_v53  ;;  %2746 = vmatprep.subr.bf16.mxu1 %v4428_v55  ;;  %v4507_v53 = vld [vmem:[#allocation5 + $0x4c4] ss:$8 sps:$4 sm:$0xff]   ;;  %v4505_v55 = vld [vmem:[#allocation5 + $0x4c0] ss:$8 sps:$4 sm:$0xff]  }
 0x17a   :  { %2951 = vmatprep.subr.bf16.mxu0 %v4431_v56  ;;  %v4508_v56 = vld [vmem:[#allocation5 + $0x9c0] ss:$8 sps:$4 sm:$0xff]  }
 0x17c   :  { %2747 = vmatpush1.bf16.msra.mxu1 %v4426_v57  ;;  %v4513_v57 = vld [vmem:[#allocation5 + $0x4d4] ss:$8 sps:$4 sm:$0xff]  }
 0x17d   :  { %2952 = vmatpush1.bf16.msra.mxu0 %v4429_v60  ;;  %2757 = vmatprep.subr.bf16.mxu1 %v4435_v40  ;;  %v4516_v60 = vld [vmem:[#allocation5 + $0x9d4] ss:$8 sps:$4 sm:$0xff]   ;;  %v4511_v40 = vld [vmem:[#allocation5 + $0x4d0] ss:$8 sps:$4 sm:$0xff]  }
 0x17e   :  { %2962 = vmatprep.subr.bf16.mxu0 %v4438_v61  ;;  %v4514_v61 = vld [vmem:[#allocation5 + $0x9d0] ss:$8 sps:$4 sm:$0xff]  }
 0x17f   :  { %2749 = vmatmul.mubr.bf16.vlgmr.msra.gmra.mrb[0].mxu1 %v259_v0  ;;  %v4520_v0 = vld [vmem:[#allocation5 + $0x9e0] ss:$8 sps:$4 sm:$0xff]  }
 0x180   :  { %2954 = vmatmul.mubr.bf16.vlgmr.msra.gmra.mrb[0].mxu0 %v269_v1  ;;  %2758 = vmatpush1.bf16.msra.mxu1 %v4433_v37  ;;  %v4519_v37 = vld [vmem:[#allocation5 + $0x4e4] ss:$8 sps:$4 sm:$0xff]   ;;  %v5099_v1 = vrot.slane %v5095_v62, %v5019_v49 }
 0x181   :  { %2963 = vmatpush1.bf16.msra.mxu0 %v4436_v27  ;;  %2759 = vmatprep.subr.bf16.mxu1 %v4441_v2  ;;  %v4522_v27 = vld [vmem:[#allocation5 + $0x9e4] ss:$8 sps:$4 sm:$0xff]   ;;  %v4525_v2 = vld [vmem:[#allocation5 + $0x4f4] ss:$8 sps:$4 sm:$0xff]  }
 0x182   :  { %2964 = vmatprep.subr.bf16.mxu0 %v4444_v3  ;;  %2789 = vmatprep.mubr.bf16.mxu1 %v262_v6  ;;  %v4528_v3 = vld [vmem:[#allocation5 + $0x9f4] ss:$8 sps:$4 sm:$0xff]   ;;  %v227_v6 = vcombine.high %v5099_v1, %v5099_v1 }
 0x183   :  { %2994 = vmatprep.mubr.bf16.mxu0 %v272_v7  ;;  %v4532_v7 = vld [vmem:[#allocation5 + $0xa04] ss:$8 sps:$4 sm:$0xff]  }
 0x184   :  { %2760 = vmatpush1.bf16.msra.mxu1 %v4439_v4  ;;  %v4523_v4 = vld [vmem:[#allocation5 + $0x4f0] ss:$8 sps:$4 sm:$0xff]  }
 0x185   :  { %2965 = vmatpush1.bf16.msra.mxu0 %v4442_v5  ;;  %2761 = vmatprep.subr.bf16.mxu1 %v4447_v8  ;;  %v4526_v5 = vld [vmem:[#allocation5 + $0x9f0] ss:$8 sps:$4 sm:$0xff]   ;;  %v261_v8 = vpack.c.bf16 %v5082_v58, %v5082_v58  ;;  %v4541_v58 = vld [vmem:[#allocation5 + $0xa34] ss:$8 sps:$4 sm:$0xff]  }
 0x186   :  { %2966 = vmatprep.subr.bf16.mxu0 %v4450_v9  ;;  %v271_v9 = vpack.c.bf16 %v5085_v59, %v5085_v59  ;;  %v4544_v59 = vld [vmem:[#allocation5 + $0xa44] ss:$8 sps:$4 sm:$0xff]  }
 0x188   :  { %2762 = vmatpush1.bf16.msra.mxu1 %v4445_v14  ;;  %v4530_v14 = vld [vmem:[#allocation5 + $0xa00] ss:$8 sps:$4 sm:$0xff]  }
 0x189   :  { %2967 = vmatpush1.bf16.msra.mxu0 %v4448_v44  ;;  %2763 = vmatprep.subr.bf16.mxu1 %v4453_v10  ;;  %v274_v44 = vpack.c.bf16 %v227_v6, %v227_v6  ;;  %v4535_v10 = vld [vmem:[#allocation5 + $0xa14] ss:$8 sps:$4 sm:$0xff]   ;;  %v4602_v6 = vld [vmem:[#allocation5 + $0xb80] ss:$8 sps:$4 sm:$0xff]  }
 0x18a   :  { %2968 = vmatprep.subr.bf16.mxu0 %v4456_v11  ;;  %v4533_v11 = vld [vmem:[#allocation5 + $0xa10] ss:$8 sps:$4 sm:$0xff]  }
 0x18c   :  { %2764 = vmatpush1.bf16.msra.mxu1 %v4451_v12  ;;  %v4538_v12 = vld [vmem:[#allocation5 + $0xa24] ss:$8 sps:$4 sm:$0xff]  }
 0x18d   :  { %2969 = vmatpush1.bf16.msra.mxu0 %v4454_v13  ;;  %2765 = vmatprep.subr.bf16.mxu1 %v4459_v15  ;;  %v4536_v13 = vld [vmem:[#allocation5 + $0xa20] ss:$8 sps:$4 sm:$0xff]   ;;  %v4539_v15 = vld [vmem:[#allocation5 + $0xa30] ss:$8 sps:$4 sm:$0xff]  }
 0x18e   :  { %2970 = vmatprep.subr.bf16.mxu0 %v4462_v16  ;;  %v4542_v16 = vld [vmem:[#allocation5 + $0xa40] ss:$8 sps:$4 sm:$0xff]  }
 0x190   :  { %2766 = vmatpush1.bf16.msra.mxu1 %v4457_v17  ;;  %v4547_v17 = vld [vmem:[#allocation5 + $0xa54] ss:$8 sps:$4 sm:$0xff]  }
 0x191   :  { %2971 = vmatpush1.bf16.msra.mxu0 %v4460_v18  ;;  %2767 = vmatprep.subr.bf16.mxu1 %v4465_v19  ;;  %v4545_v18 = vld [vmem:[#allocation5 + $0xa50] ss:$8 sps:$4 sm:$0xff]   ;;  %v4550_v19 = vld [vmem:[#allocation5 + $0xa64] ss:$8 sps:$4 sm:$0xff]  }
 0x192   :  { %2972 = vmatprep.subr.bf16.mxu0 %v4468_v20  ;;  %v4548_v20 = vld [vmem:[#allocation5 + $0xa60] ss:$8 sps:$4 sm:$0xff]  }
 0x194   :  { %2768 = vmatpush1.bf16.msra.mxu1 %v4463_v21  ;;  %v4553_v21 = vld [vmem:[#allocation5 + $0xa74] ss:$8 sps:$4 sm:$0xff]  }
 0x195   :  { %2973 = vmatpush1.bf16.msra.mxu0 %v4466_v22  ;;  %2769 = vmatprep.subr.bf16.mxu1 %v4471_v23  ;;  %v4551_v22 = vld [vmem:[#allocation5 + $0xa70] ss:$8 sps:$4 sm:$0xff]   ;;  %v4556_v23 = vld [vmem:[#allocation5 + $0xa84] ss:$8 sps:$4 sm:$0xff]  }
 0x196   :  { %2974 = vmatprep.subr.bf16.mxu0 %v4474_v24  ;;  %v4554_v24 = vld [vmem:[#allocation5 + $0xa80] ss:$8 sps:$4 sm:$0xff]  }
 0x198   :  { %2770 = vmatpush1.bf16.msra.mxu1 %v4469_v25  ;;  %v4559_v25 = vld [vmem:[#allocation5 + $0xa94] ss:$8 sps:$4 sm:$0xff]  }
 0x199   :  { %2975 = vmatpush1.bf16.msra.mxu0 %v4472_v26  ;;  %2771 = vmatprep.subr.bf16.mxu1 %v4477_v28  ;;  %v4557_v26 = vld [vmem:[#allocation5 + $0xa90] ss:$8 sps:$4 sm:$0xff]   ;;  %v4562_v28 = vld [vmem:[#allocation5 + $0xaa4] ss:$8 sps:$4 sm:$0xff]  }
 0x19a   :  { %2976 = vmatprep.subr.bf16.mxu0 %v4480_v29  ;;  %v4560_v29 = vld [vmem:[#allocation5 + $0xaa0] ss:$8 sps:$4 sm:$0xff]  }
 0x19c   :  { %2772 = vmatpush1.bf16.msra.mxu1 %v4475_v30  ;;  %v4565_v30 = vld [vmem:[#allocation5 + $0xab4] ss:$8 sps:$4 sm:$0xff]  }
 0x19d   :  { %2977 = vmatpush1.bf16.msra.mxu0 %v4478_v31  ;;  %2773 = vmatprep.subr.bf16.mxu1 %v4483_v32  ;;  %v4563_v31 = vld [vmem:[#allocation5 + $0xab0] ss:$8 sps:$4 sm:$0xff]   ;;  %v4568_v32 = vld [vmem:[#allocation5 + $0xac4] ss:$8 sps:$4 sm:$0xff]  }
 0x19e   :  { %2978 = vmatprep.subr.bf16.mxu0 %v4486_v33  ;;  %v4566_v33 = vld [vmem:[#allocation5 + $0xac0] ss:$8 sps:$4 sm:$0xff]  }
 0x1a0   :  { %2774 = vmatpush1.bf16.msra.mxu1 %v4481_v34  ;;  %v4571_v34 = vld [vmem:[#allocation5 + $0xad4] ss:$8 sps:$4 sm:$0xff]  }
 0x1a1   :  { %2979 = vmatpush1.bf16.msra.mxu0 %v4484_v35  ;;  %2775 = vmatprep.subr.bf16.mxu1 %v4489_v36  ;;  %v4569_v35 = vld [vmem:[#allocation5 + $0xad0] ss:$8 sps:$4 sm:$0xff]   ;;  %v212_v36 = vcombine.high %v5095_v62, %v5095_v62  ;;  %v4601_v62 = vld [vmem:[#allocation5 + $0xb74] ss:$8 sps:$4 sm:$0xff]  }
 0x1a2   :  { %2980 = vmatprep.subr.bf16.mxu0 %v4492_v38  ;;  %v4574_v38 = vld [vmem:[#allocation5 + $0xae4] ss:$8 sps:$4 sm:$0xff]  }
 0x1a4   :  { %2776 = vmatpush1.bf16.msra.mxu1 %v4487_v41  ;;  %v4572_v41 = vld [vmem:[#allocation5 + $0xae0] ss:$8 sps:$4 sm:$0xff]  }
 0x1a5   :  { %2981 = vmatpush1.bf16.msra.mxu0 %v4490_v42  ;;  %2777 = vmatprep.subr.bf16.mxu1 %v4495_v45  ;;  %v5110_v42 = vrot.slane %v212_v36, %v5019_v49  ;;  %v4577_v45 = vld [vmem:[#allocation5 + $0xaf4] ss:$8 sps:$4 sm:$0xff]   ;;  %v4581_v49 = vld [vmem:[#allocation5 + $0xb10] ss:$8 sps:$4 sm:$0xff]   ;;  %v4657_v36 = vld [vmem:[#allocation8 + $0xa0] ss:$8 sps:$4 sm:$0xff]  }
 0x1a6   :  { %2982 = vmatprep.subr.bf16.mxu0 %v4498_v39  ;;  %v4575_v39 = vld [vmem:[#allocation5 + $0xaf0] ss:$8 sps:$4 sm:$0xff]  }
 0x1a8   :  { %2778 = vmatpush1.bf16.msra.mxu1 %v4493_v46  ;;  %v228_v46 = vcombine.high %v5110_v42, %v5110_v42 }
 0x1a9   :  { %2983 = vmatpush1.bf16.msra.mxu0 %v4496_v47  ;;  %2779 = vmatprep.subr.bf16.mxu1 %v4501_v48  ;;  %v4580_v47 = vld [vmem:[#allocation5 + $0xb04] ss:$8 sps:$4 sm:$0xff]   ;;  %v273_v48 = vpack.c.bf16 %v5099_v1, %v5099_v1  ;;  %v4632_v1 = vld [vmem:[#allocation8 + $0x14] ss:$8 sps:$4 sm:$0xff]  }
 0x1aa   :  { %2984 = vmatprep.subr.bf16.mxu0 %v4504_v50  ;;  %v4578_v50 = vld [vmem:[#allocation5 + $0xb00] ss:$8 sps:$4 sm:$0xff]  }
 0x1ac   :  { %2780 = vmatpush1.bf16.msra.mxu1 %v4499_v51  ;;  %v276_v51 = vpack.c.bf16 %v228_v46, %v228_v46  ;;  %v4668_v46 = vld [vmem:[#allocation8 + $0xd4] ss:$8 sps:$4 sm:$0xff]  }
 0x1ad   :  { %2985 = vmatpush1.bf16.msra.mxu0 %v4502_v52  ;;  %2781 = vmatprep.subr.bf16.mxu1 %v4507_v53  ;;  %v4583_v52 = vld [vmem:[#allocation5 + $0xb14] ss:$8 sps:$4 sm:$0xff]   ;;  %v4586_v53 = vld [vmem:[#allocation5 + $0xb24] ss:$8 sps:$4 sm:$0xff]  }
 0x1ae   :  { %2986 = vmatprep.subr.bf16.mxu0 %v4510_v54  ;;  %v4584_v54 = vld [vmem:[#allocation5 + $0xb20] ss:$8 sps:$4 sm:$0xff]  }
 0x1b0   :  { %2782 = vmatpush1.bf16.msra.mxu1 %v4505_v55  ;;  %v4589_v55 = vld [vmem:[#allocation5 + $0xb34] ss:$8 sps:$4 sm:$0xff]  }
 0x1b1   :  { %2987 = vmatpush1.bf16.msra.mxu0 %v4508_v56  ;;  %2783 = vmatprep.subr.bf16.mxu1 %v4513_v57  ;;  %v4587_v56 = vld [vmem:[#allocation5 + $0xb30] ss:$8 sps:$4 sm:$0xff]   ;;  %v4592_v57 = vld [vmem:[#allocation5 + $0xb44] ss:$8 sps:$4 sm:$0xff]  }
 0x1b2   :  { %2988 = vmatprep.subr.bf16.mxu0 %v4516_v60  ;;  %v4590_v60 = vld [vmem:[#allocation5 + $0xb40] ss:$8 sps:$4 sm:$0xff]  }
 0x1b4   :  { %2784 = vmatpush1.bf16.msra.mxu1 %v4511_v40  ;;  %v4595_v40 = vld [vmem:[#allocation5 + $0xb54] ss:$8 sps:$4 sm:$0xff]  }
 0x1b5   :  { %2989 = vmatpush1.bf16.msra.mxu0 %v4514_v61  ;;  %2785 = vmatprep.subr.bf16.mxu1 %v4519_v37  ;;  %v4593_v61 = vld [vmem:[#allocation5 + $0xb50] ss:$8 sps:$4 sm:$0xff]   ;;  %v4598_v37 = vld [vmem:[#allocation5 + $0xb64] ss:$8 sps:$4 sm:$0xff]  }
 0x1b6   :  { %2990 = vmatprep.subr.bf16.mxu0 %v4522_v27  ;;  %v4596_v27 = vld [vmem:[#allocation5 + $0xb60] ss:$8 sps:$4 sm:$0xff]  }
 0x1b8   :  { %2786 = vmatpush1.bf16.msra.mxu1 %v4517_v63  ;;  %v4627_v63 = vld [vmem:[#allocation8] ss:$8 sps:$4 sm:$0xff]  }
 0x1b9   :  { %2991 = vmatpush1.bf16.msra.mxu0 %v4520_v0  ;;  %2787 = vmatprep.subr.bf16.mxu1 %v4525_v2  ;;  %v4629_v0 = vld [vmem:[#allocation8 + $0x4] ss:$8 sps:$4 sm:$0xff]  }
 0x1ba   :  { %2992 = vmatprep.subr.bf16.mxu0 %v4528_v3  ;;  %v4599_v2 = vld [vmem:[#allocation5 + $0xb70] ss:$8 sps:$4 sm:$0xff]  }
 0x1bb   :  { %v4630_v3 = vld [vmem:[#allocation8 + $0x10] ss:$8 sps:$4 sm:$0xff]  }
 0x1bc   :  { %2788 = vmatpush1.bf16.msra.mxu1 %v4523_v4  ;;  %v4604_v4 = vld [vmem:[#allocation5 + $0xb84] ss:$8 sps:$4 sm:$0xff]  }
 0x1bd   :  { %2993 = vmatpush1.bf16.msra.mxu0 %v4526_v5  ;;  %3293 = vmatprep.subr.bf16.mxu1 %v4629_v0  ;;  %v4635_v5 = vld [vmem:[#allocation8 + $0x24] ss:$8 sps:$4 sm:$0xff]  }
 0x1be   :  { %3003 = vmatprep.subr.bf16.mxu0 %v4532_v7  ;;  %v4633_v7 = vld [vmem:[#allocation8 + $0x20] ss:$8 sps:$4 sm:$0xff]  }
 0x1bf   :  { %2790 = vmatmul.mubr.bf16.vlgmr.msra.gmra.mrb[0].mxu1 %v261_v8  ;;  %v4607_v8 = vld [vmem:[#allocation5 + $0xb94] ss:$8 sps:$4 sm:$0xff]  }
 0x1c0   :  { %2995 = vmatmul.mubr.bf16.vlgmr.msra.gmra.mrb[0].mxu0 %v271_v9  ;;  %3294 = vmatpush1.bf16.msra.mxu1 %v4627_v63  ;;  %v4638_v9 = vld [vmem:[#allocation8 + $0x34] ss:$8 sps:$4 sm:$0xff]  }
 0x1c1   :  { %3004 = vmatpush1.bf16.msra.mxu0 %v4530_v14  ;;  %3035 = vmatprep.mubr.bf16.mxu0 %v274_v44  ;;  %v4605_v14 = vld [vmem:[#allocation5 + $0xb90] ss:$8 sps:$4 sm:$0xff]  }
 0x1c2   :  { %3005 = vmatprep.subr.bf16.mxu0 %v4535_v10  ;;  %3295 = vmatprep.subr.bf16.mxu1 %v4632_v1  ;;  %v4636_v44 = vld [vmem:[#allocation8 + $0x30] ss:$8 sps:$4 sm:$0xff]   ;;  %v4610_v10 = vld [vmem:[#allocation5 + $0xba4] ss:$8 sps:$4 sm:$0xff]  }
 0x1c4   :  { %3296 = vmatpush1.bf16.msra.mxu1 %v4630_v3 }
 0x1c5   :  { %3006 = vmatpush1.bf16.msra.mxu0 %v4533_v11  ;;  %3297 = vmatprep.subr.bf16.mxu1 %v4635_v5  ;;  %v4641_v11 = vld [vmem:[#allocation8 + $0x44] ss:$8 sps:$4 sm:$0xff]  }
 0x1c6   :  { %3007 = vmatprep.subr.bf16.mxu0 %v4538_v12  ;;  %v4608_v12 = vld [vmem:[#allocation5 + $0xba0] ss:$8 sps:$4 sm:$0xff]  }
 0x1c8   :  { %3298 = vmatpush1.bf16.msra.mxu1 %v4633_v7  ;;  %v4676_v7 = vld [vmem:[#allocation11] sm:$0xff]  }
 0x1c9   :  { %3008 = vmatpush1.bf16.msra.mxu0 %v4536_v13  ;;  %3299 = vmatprep.subr.bf16.mxu1 %v4638_v9  ;;  %v4639_v13 = vld [vmem:[#allocation8 + $0x40] ss:$8 sps:$4 sm:$0xff]  }
 0x1ca   :  { %3009 = vmatprep.subr.bf16.mxu0 %v4541_v58  ;;  %v4613_v58 = vld [vmem:[#allocation5 + $0xbb4] ss:$8 sps:$4 sm:$0xff]   ;;  %v4677_v9 = vld [vmem:[#allocation11 + $0x48] sm:$0xff]  }
 0x1cc   :  { %3300 = vmatpush1.bf16.msra.mxu1 %v4636_v44  ;;  %v4680_v44 = vld [vmem:[#allocation11 + $0x10] sm:$0xff]  }
 0x1cd   :  { %3010 = vmatpush1.bf16.msra.mxu0 %v4539_v15  ;;  %3301 = vmatprep.subr.bf16.mxu1 %v4641_v11  ;;  %v4644_v15 = vld [vmem:[#allocation8 + $0x54] ss:$8 sps:$4 sm:$0xff]  }
 0x1ce   :  { %3011 = vmatprep.subr.bf16.mxu0 %v4544_v59  ;;  %v4611_v59 = vld [vmem:[#allocation5 + $0xbb0] ss:$8 sps:$4 sm:$0xff]   ;;  %v4682_v11 = vld [vmem:[#allocation11 + $0x18] sm:$0xff]  }
 0x1d0   :  { %3302 = vmatpush1.bf16.msra.mxu1 %v4639_v13  ;;  %v4684_v13 = vld [vmem:[#allocation11 + $0x20] sm:$0xff]  }
 0x1d1   :  { %3012 = vmatpush1.bf16.msra.mxu0 %v4542_v16  ;;  %v4642_v16 = vld [vmem:[#allocation8 + $0x50] ss:$8 sps:$4 sm:$0xff]   ;;  %3303 = vmatprep.subr.bf16.mxu1 %v4644_v15 }
 0x1d2   :  { %3013 = vmatprep.subr.bf16.mxu0 %v4547_v17  ;;  %v4616_v17 = vld [vmem:[#allocation5 + $0xbc4] ss:$8 sps:$4 sm:$0xff]  }
 0x1d3   :  { %v4686_v15 = vld [vmem:[#allocation11 + $0x28] sm:$0xff]  }
 0x1d4   :  { %3304 = vmatpush1.bf16.msra.mxu1 %v4642_v16  ;;  %v4688_v16 = vld [vmem:[#allocation11 + $0x30] sm:$0xff]  }
 0x1d5   :  { %3014 = vmatpush1.bf16.msra.mxu0 %v4545_v18  ;;  %v4647_v18 = vld [vmem:[#allocation8 + $0x64] ss:$8 sps:$4 sm:$0xff]  }
 0x1d6   :  { %3015 = vmatprep.subr.bf16.mxu0 %v4550_v19  ;;  %v4614_v19 = vld [vmem:[#allocation5 + $0xbc0] ss:$8 sps:$4 sm:$0xff]   ;;  %3305 = vmatprep.subr.bf16.mxu1 %v4647_v18 }
 0x1d7   :  { %v4690_v18 = vld [vmem:[#allocation11 + $0x38] sm:$0xff]  }
 0x1d9   :  { %3016 = vmatpush1.bf16.msra.mxu0 %v4548_v20  ;;  %v4645_v20 = vld [vmem:[#allocation8 + $0x60] ss:$8 sps:$4 sm:$0xff]  }
 0x1da   :  { %3017 = vmatprep.subr.bf16.mxu0 %v4553_v21  ;;  %v4619_v21 = vld [vmem:[#allocation5 + $0xbd4] ss:$8 sps:$4 sm:$0xff]   ;;  %3306 = vmatpush1.bf16.msra.mxu1 %v4645_v20 }
 0x1dd   :  { %3018 = vmatpush1.bf16.msra.mxu0 %v4551_v22  ;;  %v4650_v22 = vld [vmem:[#allocation8 + $0x74] ss:$8 sps:$4 sm:$0xff]  }
 0x1de   :  { %3019 = vmatprep.subr.bf16.mxu0 %v4556_v23  ;;  %v4617_v23 = vld [vmem:[#allocation5 + $0xbd0] ss:$8 sps:$4 sm:$0xff]   ;;  %3307 = vmatprep.subr.bf16.mxu1 %v4650_v22 }
 0x1e1   :  { %3020 = vmatpush1.bf16.msra.mxu0 %v4554_v24  ;;  %v4648_v24 = vld [vmem:[#allocation8 + $0x70] ss:$8 sps:$4 sm:$0xff]  }
 0x1e2   :  { %3021 = vmatprep.subr.bf16.mxu0 %v4559_v25  ;;  %v4622_v25 = vld [vmem:[#allocation5 + $0xbe4] ss:$8 sps:$4 sm:$0xff]   ;;  %3308 = vmatpush1.bf16.msra.mxu1 %v4648_v24 }
 0x1e5   :  { %3022 = vmatpush1.bf16.msra.mxu0 %v4557_v26  ;;  %v4653_v26 = vld [vmem:[#allocation8 + $0x84] ss:$8 sps:$4 sm:$0xff]  }
 0x1e6   :  { %3023 = vmatprep.subr.bf16.mxu0 %v4562_v28  ;;  %v4620_v28 = vld [vmem:[#allocation5 + $0xbe0] ss:$8 sps:$4 sm:$0xff]   ;;  %3309 = vmatprep.subr.bf16.mxu1 %v4653_v26 }
 0x1e9   :  { %3024 = vmatpush1.bf16.msra.mxu0 %v4560_v29  ;;  %v4651_v29 = vld [vmem:[#allocation8 + $0x80] ss:$8 sps:$4 sm:$0xff]  }
 0x1ea   :  { %3025 = vmatprep.subr.bf16.mxu0 %v4565_v30  ;;  %v4625_v30 = vld [vmem:[#allocation5 + $0xbf4] ss:$8 sps:$4 sm:$0xff]   ;;  %3310 = vmatpush1.bf16.msra.mxu1 %v4651_v29 }
 0x1ed   :  { %3026 = vmatpush1.bf16.msra.mxu0 %v4563_v31  ;;  %v4656_v31 = vld [vmem:[#allocation8 + $0x94] ss:$8 sps:$4 sm:$0xff]  }
 0x1ee   :  { %3027 = vmatprep.subr.bf16.mxu0 %v4568_v32  ;;  %v4623_v32 = vld [vmem:[#allocation5 + $0xbf0] ss:$8 sps:$4 sm:$0xff]   ;;  %3311 = vmatprep.subr.bf16.mxu1 %v4656_v31 }
 0x1f1   :  { %3028 = vmatpush1.bf16.msra.mxu0 %v4566_v33  ;;  %v4654_v33 = vld [vmem:[#allocation8 + $0x90] ss:$8 sps:$4 sm:$0xff]  }
 0x1f2   :  { %3029 = vmatprep.subr.bf16.mxu0 %v4571_v34  ;;  %v4659_v34 = vld [vmem:[#allocation8 + $0xa4] ss:$8 sps:$4 sm:$0xff]   ;;  %3312 = vmatpush1.bf16.msra.mxu1 %v4654_v33 }
 0x1f3   :  { %3313 = vmatprep.subr.bf16.mxu1 %v4659_v34  ;;  %v3949_v34 = vld [vmem:[#allocation13] ss:$0 sm:$0xff] }
 0x1f5   :  { %3030 = vmatpush1.bf16.msra.mxu0 %v4569_v35  ;;  %v275_v35 = vpack.c.bf16 %v5110_v42, %v5110_v42 }
 0x1f6   :  { %3031 = vmatprep.subr.bf16.mxu0 %v4574_v38  ;;  %v4662_v38 = vld [vmem:[#allocation8 + $0xb4] ss:$8 sps:$4 sm:$0xff]   ;;  %3314 = vmatpush1.bf16.msra.mxu1 %v4657_v36 }
 0x1f7   :  { %3315 = vmatprep.subr.bf16.mxu1 %v4662_v38 }
 0x1f9   :  { %3032 = vmatpush1.bf16.msra.mxu0 %v4572_v41  ;;  %v4660_v41 = vld [vmem:[#allocation8 + $0xb0] ss:$8 sps:$4 sm:$0xff]  }
 0x1fa   :  { %3033 = vmatprep.subr.bf16.mxu0 %v4577_v45  ;;  %v4665_v45 = vld [vmem:[#allocation8 + $0xc4] ss:$8 sps:$4 sm:$0xff]   ;;  %3316 = vmatpush1.bf16.msra.mxu1 %v4660_v41 }
 0x1fb   :  { %3317 = vmatprep.subr.bf16.mxu1 %v4665_v45 }
 0x1fd   :  { %3034 = vmatpush1.bf16.msra.mxu0 %v4575_v39  ;;  %v4663_v39 = vld [vmem:[#allocation8 + $0xc0] ss:$8 sps:$4 sm:$0xff]  }
 0x1fe   :  { %3044 = vmatprep.subr.bf16.mxu0 %v4580_v47  ;;  %3318 = vmatpush1.bf16.msra.mxu1 %v4663_v39  ;;  %v4666_v47 = vld [vmem:[#allocation8 + $0xd0] ss:$8 sps:$4 sm:$0xff]  }
 0x1ff   :  { %3319 = vmatprep.subr.bf16.mxu1 %v4668_v46 }
 0x200   :  { %3036 = vmatmul.mubr.bf16.vlgmr.msra.gmra.mrb[0].mxu0 %v273_v48  ;;  %v4671_v48 = vld [vmem:[#allocation8 + $0xe4] ss:$8 sps:$4 sm:$0xff]  }
 0x201   :  { %3045 = vmatpush1.bf16.msra.mxu0 %v4578_v50  ;;  %3076 = vmatprep.mubr.bf16.mxu0 %v276_v51  ;;  %v4669_v50 = vld [vmem:[#allocation8 + $0xe0] ss:$8 sps:$4 sm:$0xff]  }
 0x202   :  { %3046 = vmatprep.subr.bf16.mxu0 %v4583_v52  ;;  %3320 = vmatpush1.bf16.msra.mxu1 %v4666_v47 }
 0x203   :  { %3321 = vmatprep.subr.bf16.mxu1 %v4671_v48 }
 0x205   :  { %3047 = vmatpush1.bf16.msra.mxu0 %v4581_v49 }
 0x206   :  { %3048 = vmatprep.subr.bf16.mxu0 %v4586_v53  ;;  %3322 = vmatpush1.bf16.msra.mxu1 %v4669_v50  ;;  %v4674_v53 = vld [vmem:[#allocation8 + $0xf4] ss:$8 sps:$4 sm:$0xff]  }
 0x207   :  { %3323 = vmatprep.subr.bf16.mxu1 %v4674_v53 }
 0x209   :  { %3049 = vmatpush1.bf16.msra.mxu0 %v4584_v54  ;;  %v4672_v54 = vld [vmem:[#allocation8 + $0xf0] ss:$8 sps:$4 sm:$0xff]  }
 0x20a   :  { %3050 = vmatprep.subr.bf16.mxu0 %v4589_v55  ;;  %3324 = vmatpush1.bf16.msra.mxu1 %v4672_v54  ;;  %v4675_v55 = vld [vmem:[#allocation11 + $0x40] sm:$0xff]  }
 0x20b   :  { %3966 = vmatprep.subr.bf16.mxu1 %v4675_v55 }
 0x20d   :  { %3051 = vmatpush1.bf16.msra.mxu0 %v4587_v56  ;;  %v665_v56 = vsub.s32 0, %v5016_v43 }
 0x20e   :  { %3052 = vmatprep.subr.bf16.mxu0 %v4592_v57  ;;  %v661_v57 = vld [vmem:[#allocation7] sm:$0x3] }
 0x211   :  { %3053 = vmatpush1.bf16.msra.mxu0 %v4590_v60  ;;  %v669_v60 = vsub.s32 1, %v5016_v43  ;;  %v4678_v43 = vld [vmem:[#allocation11 + $0x8] sm:$0xff]  }
 0x212   :  { %3054 = vmatprep.subr.bf16.mxu0 %v4595_v40  ;;  %v666_v40 = vrot.slane %v661_v57, %v665_v56 }
 0x215   :  { %3055 = vmatpush1.bf16.msra.mxu0 %v4593_v61  ;;  %v670_v61 = vrot.slane %v661_v57, %v669_v60 }
 0x216   :  { %3056 = vmatprep.subr.bf16.mxu0 %v4598_v37 }
 0x219   :  { %3057 = vmatpush1.bf16.msra.mxu0 %v4596_v27 }
 0x21a   :  { %3058 = vmatprep.subr.bf16.mxu0 %v4601_v62 }
 0x21d   :  { %3059 = vmatpush1.bf16.msra.mxu0 %v4599_v2 }
 0x21e   :  { %3060 = vmatprep.subr.bf16.mxu0 %v4604_v4 }
 0x221   :  { %3061 = vmatpush1.bf16.msra.mxu0 %v4602_v6 }
 0x222   :  { %3062 = vmatprep.subr.bf16.mxu0 %v4607_v8 }
 0x225   :  { %3063 = vmatpush1.bf16.msra.mxu0 %v4605_v14  ;;  %v4679_v14 = vld [vmem:[#allocation11 + $0x50] sm:$0xff]  }
 0x226   :  { %3064 = vmatprep.subr.bf16.mxu0 %v4610_v10  ;;  %v4681_v10 = vld [vmem:[#allocation11 + $0x58] sm:$0xff]  }
 0x229   :  { %3065 = vmatpush1.bf16.msra.mxu0 %v4608_v12  ;;  %v4683_v12 = vld [vmem:[#allocation11 + $0x60] sm:$0xff]  }
 0x22a   :  { %3066 = vmatprep.subr.bf16.mxu0 %v4613_v58  ;;  %v4685_v58 = vld [vmem:[#allocation11 + $0x68] sm:$0xff]  }
 0x22d   :  { %3067 = vmatpush1.bf16.msra.mxu0 %v4611_v59  ;;  %v4687_v59 = vld [vmem:[#allocation11 + $0x70] sm:$0xff]  }
 0x22e   :  { %3068 = vmatprep.subr.bf16.mxu0 %v4616_v17  ;;  %v4689_v17 = vld [vmem:[#allocation11 + $0x78] sm:$0xff]  }
 0x231   :  { %3069 = vmatpush1.bf16.msra.mxu0 %v4614_v19  ;;  %v3121_v19 = vld [vmem:[#allocation10] sm:$0x3] }
 0x232   :  { %3070 = vmatprep.subr.bf16.mxu0 %v4619_v21  ;;  %v3126_v20 = vrot.slane %v3121_v19, %v665_v56  ;;  %v3130_v21 = vrot.slane %v3121_v19, %v669_v60 }
 0x235   :  { %3071 = vmatpush1.bf16.msra.mxu0 %v4617_v23 }
 0x236   :  { %3072 = vmatprep.subr.bf16.mxu0 %v4622_v25 }
 0x239   :  { %3073 = vmatpush1.bf16.msra.mxu0 %v4620_v28 }
 0x23a   :  { %3074 = vmatprep.subr.bf16.mxu0 %v4625_v30 }
 0x23d   :  { %3075 = vmatpush1.bf16.msra.mxu0 %v4623_v32 }
 0x240   :  { %3077 = vmatmul.mubr.bf16.vlgmr.msra.gmra.mrb[0].mxu0 %v275_v35 }
 0x292   :  { %v2791_v42 = vpop.f32.mrb[0].mxu1 }
 0x293   :  { %v2793_v51 = vpop.f32.mrb[1].mxu1  ;;  %v3988_v37 = vadd.f32 %v2791_v42, %v666_v40 }
 0x294   :  { %v2795_v52 = vpop.f32.mrb[2].mxu1  ;;  %v3990_v27 = vadd.f32 %v2793_v51, %v670_v61 }
 0x295   :  { %v2796_v49 = vpop.f32.mrb[3].mxu1 }
 0x313   :  { %v3078_v62 = vpop.f32.mrb[0].mxu0 }
 0x314   :  { %v3989_v63 = vadd.f32 %v3988_v37, %v3078_v62  ;;  %v3080_v0 = vpop.f32.mrb[1].mxu0 }
 0x315   :  { %v3991_v1 = vadd.f32 %v3990_v27, %v3080_v0  ;;  %v3082_v2 = vpop.f32.mrb[2].mxu0 }
 0x316   :  { %v3085_v3 = vmax.f32 %v3989_v63, 0.0  ;;  %v3083_v4 = vpop.f32.mrb[3].mxu0 }
 0x317   :  { %v3086_v5 = vmax.f32 %v3991_v1, 0.0 }
 0x318   :  { %v3087_v8 = vpack.c.bf16 %v3085_v3, %v3085_v3 }
 0x319   :  { %v3088_v6 = vpack.c.bf16 %v3086_v5, %v3086_v5 }
 0x31b   :  { %3325 = vmatprep.mubr.bf16.mxu1 %v3088_v6 }
 0x31c   :  { %3326 = vmatmul.mubr.bf16.vlgmr.msra.gmra.mrb[4].mxu1 %v3087_v8 }
 0x31d   :  { %3967 = vmatpush3.bf16.msra.mxu1 %v4676_v7 }
 0x31e   :  { %3968 = vmatprep.subr.bf16.mxu1 %v4677_v9 }
 0x321   :  { %3969 = vmatpush3.bf16.msra.mxu1 %v4678_v43 }
 0x322   :  { %3970 = vmatprep.subr.bf16.mxu1 %v4679_v14 }
 0x325   :  { %3971 = vmatpush3.bf16.msra.mxu1 %v4680_v44 }
 0x326   :  { %3972 = vmatprep.subr.bf16.mxu1 %v4681_v10 }
 0x329   :  { %3973 = vmatpush3.bf16.msra.mxu1 %v4682_v11 }
 0x32a   :  { %3974 = vmatprep.subr.bf16.mxu1 %v4683_v12 }
 0x32d   :  { %3975 = vmatpush3.bf16.msra.mxu1 %v4684_v13 }
 0x32e   :  { %3976 = vmatprep.subr.bf16.mxu1 %v4685_v58 }
 0x331   :  { %3977 = vmatpush3.bf16.msra.mxu1 %v4686_v15 }
 0x332   :  { %3978 = vmatprep.subr.bf16.mxu1 %v4687_v59 }
 0x335   :  { %3979 = vmatpush3.bf16.msra.mxu1 %v4688_v16 }
 0x336   :  { %3980 = vmatprep.subr.bf16.mxu1 %v4689_v17 }
 0x339   :  { %3981 = vmatpush3.bf16.msra.mxu1 %v4690_v18 }
 0x3ef   :  { %v3327_v22 = vpop.f32.mrb[4].mxu1 }
 0x3f0   :  { %v3328_v23 = vadd.f32 %v3327_v22, %v3126_v20  ;;  %v3329_v24 = vpop.f32.mrb[5].mxu1 }
 0x3f1   :  { %v3330_v25 = vadd.f32 %v3329_v24, %v3130_v21  ;;  %v3331_v26 = vpop.f32.mrb[6].mxu1 }
 0x3f2   :  { %v3334_v28 = vmax.f32 %v3328_v23, 0.0  ;;  %v3332_v29 = vpop.f32.mrb[7].mxu1 }
 0x3f3   :  { %v3335_v30 = vmax.f32 %v3330_v25, 0.0 }
 0x3f4   :  { %v3336_v32 = vpack.c.bf16 %v3334_v28, %v3334_v28 }
 0x3f5   :  { %v3337_v31 = vpack.c.bf16 %v3335_v30, %v3335_v30 }
 0x3f7   :  { %3505 = vmatprep.mubr.bf16.mxu1 %v3337_v31 }
 0x3f8   :  { %3506 = vmatmul.mubr.bf16.vlgmr.msra.gmra.mrb[8].mxu1 %v3336_v32 }
 0x4cb   :  { %v3982_v33 = vpop.f32.mrb[8].mxu1 }
 0x4cc   :  { %v3983_v35 = vpop.f32.mrb[9].mxu1 }
 0x4cd   :  { %v3984_v36 = vadd.f32 %v3983_v35, %v3982_v33  ;;  %v3985_v38 = vpop.f32.mrb[10].mxu1 }
 0x4ce   :  { %v3986_v41 = vpop.f32.mrb[11].mxu1 }
 0x4cf   :  { %v3508_v45 = vadd.f32 %v3984_v36, %v3949_v34 }
 0x4d1   :  { %v3513_v39 = vpack.c.bf16 %v3508_v45, %v3508_v45 }
 0x4d3   :  { %3514 = vst [vmem:[#allocation14] sm:$0x1] %v3513_v39 }
 0x4d4   :  { %4858 = shalt.err (!%p4855_p4)
}
 0x4d5   :  { %s4859_s12 = scalar_lea.hbm %s5139_s7, 16 }
 0x4d6   :  { %p4860_p5 = scmp.ne.s32.totalorder %s5139_s7, %s4859_s12  ;;  %p4863_p6 = scmp.lt.u32.totalorder %s4859_s12, %s5139_s7 }
 0x4d8   :  { %p4865_p7 = pnand %p4863_p6, %p4860_p5 }
 0x4da   :  { %4868 = shalt.err (!%p4865_p7)
}
 0x4db   :  { %3524 = dma.vmem_to_hbm [thread:$0]  %s3522_s13, 16, %s5139_s7, [#allocation4]  }
 0x4dc   :  { %4877 = dma.done.wait [#allocation4], 16  }
 0x4dd   :  { %4878 = vsyncadd [#allocation4], 4294967280 }
 0x4de   :  { %3528 = vsyncpa [#allocation3], 1 }
 0x4df   :  { %3529 = vsyncpa [#allocation6], 1 }
 0x4e0   :  { %3530 = vsyncpa [#allocation9], 1 }
 0x4e1   :  { %3531 = vsyncpa [#allocation12], 1 }
 0x4e2   :  { %3532 = vsyncpa [#allocation4], 1 }

</bundles_post_ra>
